<compile_context>
chip_gen: v7x
topology: tpu7x:2x2x1
jax: 0.10.0
libtpu: 0.0.40
codegen_flags: <defaults>
</compile_context>

<pallas_src>
import functools

import numpy as np
import jax
import jax.numpy as jnp
from jax import lax
from jax.experimental import pallas as pl
from jax.experimental.pallas import tpu as pltpu


# ----------------------------------------------------------------------------
# Sinusoid position table (identical math to the PyTorch helper)
# ----------------------------------------------------------------------------
def get_sinusoid_encoding_table(n_position, d_hid, padding_idx=None):
    pos = np.arange(n_position, dtype=np.float64)[:, None]
    hid = np.arange(d_hid, dtype=np.float64)[None, :]
    angle = pos / np.power(10000.0, 2.0 * (np.floor(hid / 2.0)) / d_hid)
    table = angle.copy()
    table[:, 0::2] = np.sin(angle[:, 0::2])
    table[:, 1::2] = np.cos(angle[:, 1::2])
    if padding_idx is not None:
        table[padding_idx] = 0.0
    return jnp.asarray(table, dtype=jnp.float32)  # (n_position, d_hid)


# ----------------------------------------------------------------------------
# Fused decoder-stack kernel (grid axis = layers, activation resident in VMEM)
# ----------------------------------------------------------------------------
def _decoder_stack_kernel(x_ref, lens_ref,
                          wqkv_ref, bqkv_ref, wo_ref, bo_ref, ln1g_ref, ln1b_ref,
                          w1_ref, b1_ref, w2_ref, b2_ref, ln2g_ref, ln2b_ref,
                          layer_out_ref,
                          act_ref, mcol_ref, nbias_ref, *opt_scratch,
                          n_head, d_k, d_v, k1, k2, B, L):
    D = x_ref.shape[-1]
    d_inner = b1_ref.shape[-1]
    pad1 = (k1 - 1) // 2
    pad2 = (k2 - 1) // 2
    layer = pl.program_id(0)
    f32 = jnp.float32
    bf16 = jnp.bfloat16

    # ---- layer 0: seed resident activation (+halo zeros) and cache masks ----
    @pl.when(layer == 0)
    def _init():
        if pad1 > 0:
            act_ref[...] = jnp.zeros(act_ref.shape, f32)        # zero halos once
        act_ref[:, pad1:pad1 + L, :] = x_ref[...].astype(f32)   # interior = x + pos
        lens3 = lens_ref[...].reshape(B, 1, 1)                  # (B,1,1) int32
        q_pos = lax.broadcasted_iota(jnp.int32, (B, L, 1), 1)
        mcol_ref[...] = (q_pos < lens3).astype(f32).reshape(B * L, 1)
        k_pos = lax.broadcasted_iota(jnp.int32, (B, 1, L), 2)
        nbias_ref[...] = jnp.where(k_pos < lens3, 0.0, -1e9).astype(f32)
        if k2 > 1 and pad2 > 0:
            hpad = opt_scratch[0]
            hpad[...] = jnp.zeros(hpad.shape, hpad.dtype)

    mask_col = mcol_ref[...]          # (B*L, 1) f32, 1.0 = real token
    neg_bias = nbias_ref[...]         # (B, 1, L) f32, 0 / -1e9 additive key mask

    # resident activation (f32); 2-D slab for all dense algebra
    x2 = act_ref[:, pad1:pad1 + L, :].reshape(B * L, D)
    x2b = x2.astype(bf16)

    # ---- multi-head self-attention (per-head weights on leading axes) ----
    scale = 1.0 / float(d_k) ** 0.5
    ctx_heads = []
    for h in range(n_head):
        qh = jnp.dot(x2b, wqkv_ref[0, h], preferred_element_type=f32) + bqkv_ref[0, h]
        kh = jnp.dot(x2b, wqkv_ref[0, n_head + h], preferred_element_type=f32) + bqkv_ref[0, n_head + h]
        vh = jnp.dot(x2b, wqkv_ref[0, 2 * n_head + h], preferred_element_type=f32) + bqkv_ref[0, 2 * n_head + h]
        qh3 = qh.reshape(B, L, d_k).astype(bf16)
        kh3 = kh.reshape(B, L, d_k).astype(bf16)
        vh3 = vh.reshape(B, L, d_v).astype(bf16)
        s = lax.dot_general(qh3, kh3, (((2,), (2,)), ((0,), (0,))),
                            preferred_element_type=f32) * scale          # (B, L, L)
        s = s + neg_bias
        s = s - jnp.max(s, axis=-1, keepdims=True)
        p = jnp.exp(s)
        p = p * pl.reciprocal(jnp.sum(p, axis=-1, keepdims=True), approx=True)
        ctx = lax.dot_general(p.astype(bf16), vh3, (((2,), (1,)), ((0,), (0,))),
                              preferred_element_type=f32)                # (B, L, d_v)
        ctx_heads.append(ctx.reshape(B * L, d_v))
    ctx_all = ctx_heads[0] if n_head == 1 else jnp.concatenate(ctx_heads, axis=-1)
    # single output projection: one MXU push with K = n_head*d_v
    attn = jnp.dot(ctx_all.astype(bf16), wo_ref[0], preferred_element_type=f32) + bo_ref[0]

    # residual + LayerNorm + masked_fill (f32)
    y = attn + x2
    mu = jnp.mean(y, axis=-1, keepdims=True)
    var = jnp.mean(jnp.square(y - mu), axis=-1, keepdims=True)
    y = (y - mu) * lax.rsqrt(var + 1e-5)
    y = y * ln1g_ref[0] + ln1b_ref[0]
    y = y * mask_col

    # ---- position-wise conv FFN (conv-1 taps read the zero-halo resident buffer) ----
    if pad1 > 0:
        act_ref[:, pad1:pad1 + L, :] = y.reshape(B, L, D)
    acc = None
    for j in range(k1):
        if pad1 > 0:
            tap = act_ref[:, j:j + L, :].reshape(B * L, D).astype(bf16)
        else:
            tap = y.astype(bf16)
        t = jnp.dot(tap, w1_ref[0, j], preferred_element_type=f32)
        acc = t if acc is None else acc + t
    h1 = jnp.maximum(acc + b1_ref[0], 0.0)                                # (B*L, d_inner)

    if k2 == 1:
        y2 = jnp.dot(h1.astype(bf16), w2_ref[0, 0], preferred_element_type=f32)
    else:
        hpad = opt_scratch[0]                                             # bf16 halo buffer
        hpad[:, pad2:pad2 + L, :] = h1.reshape(B, L, d_inner).astype(bf16)
        y2 = None
        for j in range(k2):
            t = jnp.dot(hpad[:, j:j + L, :].reshape(B * L, d_inner), w2_ref[0, j],
                        preferred_element_type=f32)
            y2 = t if y2 is None else y2 + t
    y2 = y2 + b2_ref[0]

    # residual + LayerNorm + masked_fill (f32)
    z = y2 + y
    mu = jnp.mean(z, axis=-1, keepdims=True)
    var = jnp.mean(jnp.square(z - mu), axis=-1, keepdims=True)
    z = (z - mu) * lax.rsqrt(var + 1e-5)
    z = z * ln2g_ref[0] + ln2b_ref[0]
    z = z * mask_col

    z3 = z.reshape(B, L, D)
    act_ref[:, pad1:pad1 + L, :] = z3                    # carry to next layer (halos stay 0)
    layer_out_ref[0] = z3.astype(layer_out_ref.dtype)    # per-layer output slice


# ----------------------------------------------------------------------------
# pallas_call wrapper
# ----------------------------------------------------------------------------
def run_decoder_stack(x_in, lengths, p, *, n_head, d_k, d_v, k1, k2):
    B, L, D = x_in.shape
    n_layers = p['wqkv'].shape[0]
    d_inner = p['b1'].shape[-1]
    Hdv = n_head * d_v
    pad1 = (k1 - 1) // 2
    pad2 = (k2 - 1) // 2

    kern = functools.partial(_decoder_stack_kernel, n_head=n_head, d_k=d_k, d_v=d_v,
                             k1=k1, k2=k2, B=B, L=L)

    scratch = [pltpu.VMEM((B, L + 2 * pad1, D), jnp.float32),   # resident act + conv1 halo
               pltpu.VMEM((B * L, 1), jnp.float32),             # cached query/column mask
               pltpu.VMEM((B, 1, L), jnp.float32)]              # cached additive key mask
    if k2 > 1:
        scratch.append(pltpu.VMEM((B, L + 2 * pad2, d_inner), jnp.bfloat16))

    lyr3 = lambda l: (l, 0, 0)
    lyr4 = lambda l: (l, 0, 0, 0)

    grid_spec = pltpu.PrefetchScalarGridSpec(
        num_scalar_prefetch=0,
        grid=(n_layers,),
        in_specs=[
            pl.BlockSpec((B, L, D), lambda l: (0, 0, 0)),           # x + pos (seed, layer 0)
            pl.BlockSpec((B, 1), lambda l: (0, 0)),                 # lengths (int32)
            pl.BlockSpec((1, 3 * n_head, D, d_k), lyr4),            # per-head q/k/v weights
            pl.BlockSpec((1, 3 * n_head, 1, d_k), lyr4),            # per-head q/k/v biases
            pl.BlockSpec((1, Hdv, D), lyr3),                        # wo
            pl.BlockSpec((1, 1, D), lyr3),                          # bo
            pl.BlockSpec((1, 1, D), lyr3),                          # ln1_g
            pl.BlockSpec((1, 1, D), lyr3),                          # ln1_b
            pl.BlockSpec((1, k1, D, d_inner), lyr4),                # w1
            pl.BlockSpec((1, 1, d_inner), lyr3),                    # b1
            pl.BlockSpec((1, k2, d_inner, D), lyr4),                # w2
            pl.BlockSpec((1, 1, D), lyr3),                          # b2
            pl.BlockSpec((1, 1, D), lyr3),                          # ln2_g
            pl.BlockSpec((1, 1, D), lyr3),                          # ln2_b
        ],
        out_specs=pl.BlockSpec((1, B, L, D), lyr4),                 # per-layer outputs
        scratch_shapes=scratch,
    )

    layer_outs = pl.pallas_call(
        kern,
        grid_spec=grid_spec,
        out_shape=jax.ShapeDtypeStruct((n_layers, B, L, D), x_in.dtype),
        compiler_params=pltpu.CompilerParams(
            dimension_semantics=("arbitrary",),
            vmem_limit_bytes=32 * 1024 * 1024),
    )(x_in, lengths.reshape(B, 1).astype(jnp.int32),
      p['wqkv'], p['bqkv'], p['wo'], p['bo'], p['ln1_g'], p['ln1_b'],
      p['w1'], p['b1'], p['w2'], p['b2'], p['ln2_g'], p['ln2_b'])
    return layer_outs


# ----------------------------------------------------------------------------
# Parameter construction (deterministic, synthetic), weights stacked per layer
# ----------------------------------------------------------------------------
def init_decoder_params(key, config):
    t = config['transformer']
    d_model = t['decoder_hidden']
    d_word_vec = t['encoder_hidden']
    n_head = t['decoder_head']
    d_k = d_v = d_model // n_head
    d_inner = t['conv_filter_size']
    k1, k2 = t['conv_kernel_size']
    n_layers = t['decoder_layer']
    n_position = config['max_seq_len'] + 1
    Hdv = n_head * d_v
    assert d_k == d_v

    ks = jax.random.split(key, 4)
    s = 0.05
    return {
        'pos_enc': get_sinusoid_encoding_table(n_position, d_word_vec),
        # q/k/v weights per head on LEADING axes (q heads, then k heads, then v heads); bf16
        'wqkv': (s * jax.random.normal(ks[0], (n_layers, 3 * n_head, d_model, d_k))).astype(jnp.bfloat16),
        'bqkv': jnp.zeros((n_layers, 3 * n_head, 1, d_k), jnp.float32),
        'wo': (s * jax.random.normal(ks[1], (n_layers, Hdv, d_model))).astype(jnp.bfloat16),
        'bo': jnp.zeros((n_layers, 1, d_model), jnp.float32),
        'ln1_g': jnp.ones((n_layers, 1, d_model), jnp.float32),
        'ln1_b': jnp.zeros((n_layers, 1, d_model), jnp.float32),
        # conv weights stored as (layer, kernel_tap, in_ch, out_ch); bf16
        'w1': (s * jax.random.normal(ks[2], (n_layers, k1, d_model, d_inner))).astype(jnp.bfloat16),
        'b1': jnp.zeros((n_layers, 1, d_inner), jnp.float32),
        'w2': (s * jax.random.normal(ks[3], (n_layers, k2, d_inner, d_model))).astype(jnp.bfloat16),
        'b2': jnp.zeros((n_layers, 1, d_model), jnp.float32),
        'ln2_g': jnp.ones((n_layers, 1, d_model), jnp.float32),
        'ln2_b': jnp.zeros((n_layers, 1, d_model), jnp.float32),
    }


# ----------------------------------------------------------------------------
# Decoder forward (eval mode)
# ----------------------------------------------------------------------------
def decoder_forward(enc_seq, mask, params, config,
                    control_bias_array=(1.0,) + (0.0,) * 10):
    t = config['transformer']
    d_model = t['decoder_hidden']
    n_head = t['decoder_head']
    d_k = d_v = d_model // n_head
    k1, k2 = t['conv_kernel_size']
    max_seq_len = config['max_seq_len']

    B, seq_len, _ = enc_seq.shape
    if seq_len > max_seq_len:
        # eval-mode long-sequence branch: on-the-fly positional table, no truncation
        x = enc_seq
        pos = get_sinusoid_encoding_table(seq_len, d_model)[:seq_len, :]
    else:
        max_len = min(seq_len, max_seq_len)
        x = enc_seq[:, :max_len, :]
        mask = mask[:, :max_len]
        pos = params['pos_enc'][:max_len, :]

    # mask is the standard contiguous-tail padding mask (True = padded) -> lengths.
    lengths = jnp.sum(jnp.logical_not(mask).astype(jnp.int32), axis=-1)

    pos_added = x + pos[None, :, :]          # tiny add done in the wrapper (also the
                                             # by-layer slab #2), seeds the kernel.

    # TODO(synk): EmbeddingBias.layer_control source is not provided in the reference;
    # treated as identity (control_bias_array unused).
    layer_outs = run_decoder_stack(pos_added, lengths, params,
                                   n_head=n_head, d_k=d_k, d_v=d_v, k1=k1, k2=k2)

    dec_output = layer_outs[-1]
    dec_output_by_layer = jnp.concatenate([x[None], pos_added[None], layer_outs], axis=0)
    return dec_output, mask, dec_output_by_layer


# ----------------------------------------------------------------------------
# Main
# ----------------------------------------------------------------------------
if __name__ == "__main__":
    config = {
        'max_seq_len': 8,
        'transformer': {
            'encoder_hidden': 32,
            'decoder_hidden': 32,
            'decoder_layer': 2,
            'decoder_head': 2,
            'conv_filter_size': 64,
            'conv_kernel_size': [3, 1],
            'decoder_dropout': 0.1,   # eval mode -> identity
        },
    }

    key = jax.random.PRNGKey(0)
    k_in, k_par = jax.random.split(key)

    B, L, D = 2, 8, config['transformer']['encoder_hidden']
    enc_seq = jax.random.normal(k_in, (B, L, D), dtype=jnp.float32)
    lengths = jnp.array([8, 6], dtype=jnp.int32)
    mask = jnp.arange(L)[None, :] >= lengths[:, None]           # True = padded

    params = init_decoder_params(k_par, config)

    dec_output, out_mask, dec_output_by_layer = decoder_forward(
        enc_seq, mask, params, config)
    jax.block_until_ready(dec_output)
    jax.block_until_ready(dec_output_by_layer)

    assert dec_output.shape == (B, L, D)
    assert out_mask.shape == (B, L)
    assert dec_output_by_layer.shape == (config['transformer']['decoder_layer'] + 2, B, L, D)
    assert bool(jnp.all(jnp.isfinite(dec_output)))
    assert bool(jnp.all(jnp.isfinite(dec_output_by_layer)))
    # padded positions must be zeroed by the FFT-block masked_fill
    assert float(jnp.max(jnp.abs(jnp.where(mask[:, :, None], dec_output, 0.0)))) == 0.0

    print("KERNEL_OK")
</pallas_src>

<mosaic_0001>
module attributes {stable_mosaic.version = 11 : i64} {
  func.func @_decoder_stack_kernel(%arg0: i32, %arg1: memref<2x8x32xf32, #tpu.memory_space<vmem>>, %arg2: memref<2x1xi32, #tpu.memory_space<vmem>>, %arg3: memref<1x6x32x16xbf16, #tpu.memory_space<vmem>>, %arg4: memref<1x6x1x16xf32, #tpu.memory_space<vmem>>, %arg5: memref<1x32x32xbf16, #tpu.memory_space<vmem>>, %arg6: memref<1x1x32xf32, #tpu.memory_space<vmem>>, %arg7: memref<1x1x32xf32, #tpu.memory_space<vmem>>, %arg8: memref<1x1x32xf32, #tpu.memory_space<vmem>>, %arg9: memref<1x3x32x64xbf16, #tpu.memory_space<vmem>>, %arg10: memref<1x1x64xf32, #tpu.memory_space<vmem>>, %arg11: memref<1x1x64x32xbf16, #tpu.memory_space<vmem>>, %arg12: memref<1x1x32xf32, #tpu.memory_space<vmem>>, %arg13: memref<1x1x32xf32, #tpu.memory_space<vmem>>, %arg14: memref<1x1x32xf32, #tpu.memory_space<vmem>>, %arg15: memref<1x2x8x32xf32, #tpu.memory_space<vmem>>, %arg16: memref<2x10x32xf32, #tpu.memory_space<vmem>>, %arg17: memref<16x1xf32, #tpu.memory_space<vmem>>, %arg18: memref<2x1x8xf32, #tpu.memory_space<vmem>>) attributes {dimension_semantics = [#tpu.dimension_semantics<arbitrary>], iteration_bounds = array<i64: 2>, scalar_prefetch = 0 : i64, scratch_operands = 3 : i64, tpu.core_type = #tpu.core_type<tc>, window_params = [{pipeline_mode = #tpu.pipeline_mode<synchronous>, transform_indices = @transform_0, window_bounds = array<i64: 2, 8, 32>}, {pipeline_mode = #tpu.pipeline_mode<synchronous>, transform_indices = @transform_1, window_bounds = array<i64: 2, 1>}, {transform_indices = @transform_2, window_bounds = array<i64: 1, 6, 32, 16>}, {transform_indices = @transform_3, window_bounds = array<i64: 1, 6, 1, 16>}, {transform_indices = @transform_4, window_bounds = array<i64: 1, 32, 32>}, {transform_indices = @transform_5, window_bounds = array<i64: 1, 1, 32>}, {transform_indices = @transform_6, window_bounds = array<i64: 1, 1, 32>}, {transform_indices = @transform_7, window_bounds = array<i64: 1, 1, 32>}, {transform_indices = @transform_8, window_bounds = array<i64: 1, 3, 32, 64>}, {transform_indices = @transform_9, window_bounds = array<i64: 1, 1, 64>}, {transform_indices = @transform_10, window_bounds = array<i64: 1, 1, 64, 32>}, {transform_indices = @transform_11, window_bounds = array<i64: 1, 1, 32>}, {transform_indices = @transform_12, window_bounds = array<i64: 1, 1, 32>}, {transform_indices = @transform_13, window_bounds = array<i64: 1, 1, 32>}, {transform_indices = @transform_14, window_bounds = array<i64: 1, 2, 8, 32>}]} {
    %c0_i32 = arith.constant 0 : i32
    %0 = arith.cmpi eq, %arg0, %c0_i32 : i32
    %1 = arith.extui %0 : i1 to i32
    %c0_i32_0 = arith.constant 0 : i32
    %2 = arith.cmpi ne, %1, %c0_i32_0 : i32
    scf.if %2 {
      %cst_141 = arith.constant 0.000000e+00 : f32
      %206 = vector.broadcast %cst_141 : f32 to vector<2x10x32xf32>
      %c0_142 = arith.constant 0 : index
      %c0_143 = arith.constant 0 : index
      %c0_144 = arith.constant 0 : index
      %207 = vector.load %arg16[%c0_142, %c0_143, %c0_144] : memref<2x10x32xf32, #tpu.memory_space<vmem>>, vector<2x10x32xf32>
      tpu.vector_store %arg16[%c0_142, %c0_143, %c0_144], %206 {strides = array<i32>} : memref<2x10x32xf32, #tpu.memory_space<vmem>>, vector<2x10x32xf32>,
      %c0_145 = arith.constant 0 : index
      %c0_146 = arith.constant 0 : index
      %c0_147 = arith.constant 0 : index
      %208 = vector.load %arg1[%c0_145, %c0_146, %c0_147] : memref<2x8x32xf32, #tpu.memory_space<vmem>>, vector<2x8x32xf32>
      %c0_148 = arith.constant 0 : index
      %c1_149 = arith.constant 1 : index
      %c0_150 = arith.constant 0 : index
      %209 = vector.load %arg16[%c0_148, %c1_149, %c0_150] : memref<2x10x32xf32, #tpu.memory_space<vmem>>, vector<2x8x32xf32>
      tpu.vector_store %arg16[%c0_148, %c1_149, %c0_150], %208 {strides = array<i32>} : memref<2x10x32xf32, #tpu.memory_space<vmem>>, vector<2x8x32xf32>,
      %c0_151 = arith.constant 0 : index
      %c0_152 = arith.constant 0 : index
      %210 = vector.load %arg2[%c0_151, %c0_152] : memref<2x1xi32, #tpu.memory_space<vmem>>, vector<2x1xi32>
      %211 = vector.shape_cast %210 : vector<2x1xi32> to vector<2x1x1xi32>
      %212 = tpu.iota {dimensions = array<i32: 1>} : vector<2x8x1xi32>
      %213 = vector.broadcast %211 : vector<2x1x1xi32> to vector<2x8x1xi32>
      %214 = arith.cmpi slt, %212, %213 : vector<2x8x1xi32>
      %215 = arith.extui %214 : vector<2x8x1xi1> to vector<2x8x1xi32>
      %216 = arith.sitofp %215 : vector<2x8x1xi32> to vector<2x8x1xf32>
      %217 = vector.shape_cast %216 : vector<2x8x1xf32> to vector<16x1xf32>
      %c0_153 = arith.constant 0 : index
      %c0_154 = arith.constant 0 : index
      %218 = vector.load %arg17[%c0_153, %c0_154] : memref<16x1xf32, #tpu.memory_space<vmem>>, vector<16x1xf32>
      tpu.vector_store %arg17[%c0_153, %c0_154], %217 {strides = array<i32>} : memref<16x1xf32, #tpu.memory_space<vmem>>, vector<16x1xf32>,
      %219 = tpu.iota {dimensions = array<i32: 2>} : vector<2x1x8xi32>
      %220 = vector.broadcast %211 : vector<2x1x1xi32> to vector<2x1x8xi32>
      %221 = arith.cmpi slt, %219, %220 : vector<2x1x8xi32>
      %cst_155 = arith.constant 0.000000e+00 : f32
      %cst_156 = arith.constant -1.000000e+09 : f32
      %222 = vector.broadcast %cst_155 : f32 to vector<2x1x8xf32>
      %223 = vector.broadcast %cst_156 : f32 to vector<2x1x8xf32>
      %224 = arith.select %221, %222, %223 : vector<2x1x8xi1>, vector<2x1x8xf32>
      %c0_157 = arith.constant 0 : index
      %c0_158 = arith.constant 0 : index
      %c0_159 = arith.constant 0 : index
      %225 = vector.load %arg18[%c0_157, %c0_158, %c0_159] : memref<2x1x8xf32, #tpu.memory_space<vmem>>, vector<2x1x8xf32>
      tpu.vector_store %arg18[%c0_157, %c0_158, %c0_159], %224 {strides = array<i32>} : memref<2x1x8xf32, #tpu.memory_space<vmem>>, vector<2x1x8xf32>,
    } else {
    }
    %c0 = arith.constant 0 : index
    %c0_1 = arith.constant 0 : index
    %3 = vector.load %arg17[%c0, %c0_1] : memref<16x1xf32, #tpu.memory_space<vmem>>, vector<16x1xf32>
    %c0_2 = arith.constant 0 : index
    %c0_3 = arith.constant 0 : index
    %c0_4 = arith.constant 0 : index
    %4 = vector.load %arg18[%c0_2, %c0_3, %c0_4] : memref<2x1x8xf32, #tpu.memory_space<vmem>>, vector<2x1x8xf32>
    %c0_5 = arith.constant 0 : index
    %c1 = arith.constant 1 : index
    %c0_6 = arith.constant 0 : index
    %5 = vector.load %arg16[%c0_5, %c1, %c0_6] : memref<2x10x32xf32, #tpu.memory_space<vmem>>, vector<2x8x32xf32>
    %6 = vector.shape_cast %5 : vector<2x8x32xf32> to vector<16x32xf32>
    %7 = arith.truncf %6 : vector<16x32xf32> to vector<16x32xbf16>
    %c0_7 = arith.constant 0 : index
    %c0_8 = arith.constant 0 : index
    %c0_9 = arith.constant 0 : index
    %c0_10 = arith.constant 0 : index
    %8 = vector.load %arg3[%c0_7, %c0_8, %c0_9, %c0_10] : memref<1x6x32x16xbf16, #tpu.memory_space<vmem>>, vector<1x1x32x16xbf16>
    %9 = vector.shape_cast %8 : vector<1x1x32x16xbf16> to vector<32x16xbf16>
    %cst = arith.constant dense<0.000000e+00> : vector<16x16xf32>
    %10 = tpu.matmul %7, %9, %cst {dimension_numbers = #tpu.dot_dimension_numbers<[1], [0], [0], [1], [0, 0, 1, 1], [], []>} : vector<16x32xbf16>, vector<32x16xbf16>, vector<16x16xf32> -> vector<16x16xf32>
    %c0_11 = arith.constant 0 : index
    %c0_12 = arith.constant 0 : index
    %c0_13 = arith.constant 0 : index
    %c0_14 = arith.constant 0 : index
    %11 = vector.load %arg4[%c0_11, %c0_12, %c0_13, %c0_14] : memref<1x6x1x16xf32, #tpu.memory_space<vmem>>, vector<1x1x1x16xf32>
    %12 = vector.shape_cast %11 : vector<1x1x1x16xf32> to vector<1x16xf32>
    %13 = vector.broadcast %12 : vector<1x16xf32> to vector<16x16xf32>
    %14 = arith.addf %10, %13 : vector<16x16xf32>
    %c0_15 = arith.constant 0 : index
    %c2 = arith.constant 2 : index
    %c0_16 = arith.constant 0 : index
    %c0_17 = arith.constant 0 : index
    %15 = vector.load %arg3[%c0_15, %c2, %c0_16, %c0_17] : memref<1x6x32x16xbf16, #tpu.memory_space<vmem>>, vector<1x1x32x16xbf16>
    %16 = vector.shape_cast %15 : vector<1x1x32x16xbf16> to vector<32x16xbf16>
    %cst_18 = arith.constant dense<0.000000e+00> : vector<16x16xf32>
    %17 = tpu.matmul %7, %16, %cst_18 {dimension_numbers = #tpu.dot_dimension_numbers<[1], [0], [0], [1], [0, 0, 1, 1], [], []>} : vector<16x32xbf16>, vector<32x16xbf16>, vector<16x16xf32> -> vector<16x16xf32>
    %c0_19 = arith.constant 0 : index
    %c2_20 = arith.constant 2 : index
    %c0_21 = arith.constant 0 : index
    %c0_22 = arith.constant 0 : index
    %18 = vector.load %arg4[%c0_19, %c2_20, %c0_21, %c0_22] : memref<1x6x1x16xf32, #tpu.memory_space<vmem>>, vector<1x1x1x16xf32>
    %19 = vector.shape_cast %18 : vector<1x1x1x16xf32> to vector<1x16xf32>
    %20 = vector.broadcast %19 : vector<1x16xf32> to vector<16x16xf32>
    %21 = arith.addf %17, %20 : vector<16x16xf32>
    %c0_23 = arith.constant 0 : index
    %c4 = arith.constant 4 : index
    %c0_24 = arith.constant 0 : index
    %c0_25 = arith.constant 0 : index
    %22 = vector.load %arg3[%c0_23, %c4, %c0_24, %c0_25] : memref<1x6x32x16xbf16, #tpu.memory_space<vmem>>, vector<1x1x32x16xbf16>
    %23 = vector.shape_cast %22 : vector<1x1x32x16xbf16> to vector<32x16xbf16>
    %cst_26 = arith.constant dense<0.000000e+00> : vector<16x16xf32>
    %24 = tpu.matmul %7, %23, %cst_26 {dimension_numbers = #tpu.dot_dimension_numbers<[1], [0], [0], [1], [0, 0, 1, 1], [], []>} : vector<16x32xbf16>, vector<32x16xbf16>, vector<16x16xf32> -> vector<16x16xf32>
    %c0_27 = arith.constant 0 : index
    %c4_28 = arith.constant 4 : index
    %c0_29 = arith.constant 0 : index
    %c0_30 = arith.constant 0 : index
    %25 = vector.load %arg4[%c0_27, %c4_28, %c0_29, %c0_30] : memref<1x6x1x16xf32, #tpu.memory_space<vmem>>, vector<1x1x1x16xf32>
    %26 = vector.shape_cast %25 : vector<1x1x1x16xf32> to vector<1x16xf32>
    %27 = vector.broadcast %26 : vector<1x16xf32> to vector<16x16xf32>
    %28 = arith.addf %24, %27 : vector<16x16xf32>
    %29 = vector.shape_cast %14 : vector<16x16xf32> to vector<2x8x16xf32>
    %30 = arith.truncf %29 : vector<2x8x16xf32> to vector<2x8x16xbf16>
    %31 = vector.shape_cast %21 : vector<16x16xf32> to vector<2x8x16xf32>
    %32 = arith.truncf %31 : vector<2x8x16xf32> to vector<2x8x16xbf16>
    %33 = vector.shape_cast %28 : vector<16x16xf32> to vector<2x8x16xf32>
    %34 = arith.truncf %33 : vector<2x8x16xf32> to vector<2x8x16xbf16>
    %cst_31 = arith.constant dense<0.000000e+00> : vector<2x8x8xf32>
    %35 = tpu.matmul %30, %32, %cst_31 {dimension_numbers = #tpu.dot_dimension_numbers<[2], [2], [1], [1], [0, 0, 0, 1, 1, 1], [0], [0]>} : vector<2x8x16xbf16>, vector<2x8x16xbf16>, vector<2x8x8xf32> -> vector<2x8x8xf32>
    %cst_32 = arith.constant 2.500000e-01 : f32
    %36 = vector.broadcast %cst_32 : f32 to vector<2x8x8xf32>
    %37 = arith.mulf %35, %36 : vector<2x8x8xf32>
    %38 = vector.broadcast %4 : vector<2x1x8xf32> to vector<2x8x8xf32>
    %39 = arith.addf %37, %38 : vector<2x8x8xf32>
    %cst_33 = arith.constant dense<0xFF800000> : vector<2x8xf32>
    %40 = vector.multi_reduction <maximumf>, %39, %cst_33 [2] : vector<2x8x8xf32> to vector<2x8xf32>
    %41 = vector.shape_cast %40 : vector<2x8xf32> to vector<2x8x1xf32>
    %42 = vector.broadcast %41 : vector<2x8x1xf32> to vector<2x8x8xf32>
    %43 = arith.subf %39, %42 : vector<2x8x8xf32>
    %44 = math.exp %43 : vector<2x8x8xf32>
    %cst_34 = arith.constant dense<0.000000e+00> : vector<2x8xf32>
    %45 = vector.multi_reduction <add>, %44, %cst_34 [2] : vector<2x8x8xf32> to vector<2x8xf32>
    %46 = vector.shape_cast %45 : vector<2x8xf32> to vector<2x8x1xf32>
    %47 = tpu.reciprocal %46 {approx = true} : vector<2x8x1xf32> -> vector<2x8x1xf32>
    %48 = vector.broadcast %47 : vector<2x8x1xf32> to vector<2x8x8xf32>
    %49 = arith.mulf %44, %48 : vector<2x8x8xf32>
    %50 = arith.truncf %49 : vector<2x8x8xf32> to vector<2x8x8xbf16>
    %cst_35 = arith.constant dense<0.000000e+00> : vector<2x8x16xf32>
    %51 = tpu.matmul %50, %34, %cst_35 {dimension_numbers = #tpu.dot_dimension_numbers<[2], [1], [1], [2], [0, 0, 0, 1, 1, 2], [0], [0]>} : vector<2x8x8xbf16>, vector<2x8x16xbf16>, vector<2x8x16xf32> -> vector<2x8x16xf32>
    %52 = vector.shape_cast %51 : vector<2x8x16xf32> to vector<16x16xf32>
    %c0_36 = arith.constant 0 : index
    %c1_37 = arith.constant 1 : index
    %c0_38 = arith.constant 0 : index
    %c0_39 = arith.constant 0 : index
    %53 = vector.load %arg3[%c0_36, %c1_37, %c0_38, %c0_39] : memref<1x6x32x16xbf16, #tpu.memory_space<vmem>>, vector<1x1x32x16xbf16>
    %54 = vector.shape_cast %53 : vector<1x1x32x16xbf16> to vector<32x16xbf16>
    %cst_40 = arith.constant dense<0.000000e+00> : vector<16x16xf32>
    %55 = tpu.matmul %7, %54, %cst_40 {dimension_numbers = #tpu.dot_dimension_numbers<[1], [0], [0], [1], [0, 0, 1, 1], [], []>} : vector<16x32xbf16>, vector<32x16xbf16>, vector<16x16xf32> -> vector<16x16xf32>
    %c0_41 = arith.constant 0 : index
    %c1_42 = arith.constant 1 : index
    %c0_43 = arith.constant 0 : index
    %c0_44 = arith.constant 0 : index
    %56 = vector.load %arg4[%c0_41, %c1_42, %c0_43, %c0_44] : memref<1x6x1x16xf32, #tpu.memory_space<vmem>>, vector<1x1x1x16xf32>
    %57 = vector.shape_cast %56 : vector<1x1x1x16xf32> to vector<1x16xf32>
    %58 = vector.broadcast %57 : vector<1x16xf32> to vector<16x16xf32>
    %59 = arith.addf %55, %58 : vector<16x16xf32>
    %c0_45 = arith.constant 0 : index
    %c3 = arith.constant 3 : index
    %c0_46 = arith.constant 0 : index
    %c0_47 = arith.constant 0 : index
    %60 = vector.load %arg3[%c0_45, %c3, %c0_46, %c0_47] : memref<1x6x32x16xbf16, #tpu.memory_space<vmem>>, vector<1x1x32x16xbf16>
    %61 = vector.shape_cast %60 : vector<1x1x32x16xbf16> to vector<32x16xbf16>
    %cst_48 = arith.constant dense<0.000000e+00> : vector<16x16xf32>
    %62 = tpu.matmul %7, %61, %cst_48 {dimension_numbers = #tpu.dot_dimension_numbers<[1], [0], [0], [1], [0, 0, 1, 1], [], []>} : vector<16x32xbf16>, vector<32x16xbf16>, vector<16x16xf32> -> vector<16x16xf32>
    %c0_49 = arith.constant 0 : index
    %c3_50 = arith.constant 3 : index
    %c0_51 = arith.constant 0 : index
    %c0_52 = arith.constant 0 : index
    %63 = vector.load %arg4[%c0_49, %c3_50, %c0_51, %c0_52] : memref<1x6x1x16xf32, #tpu.memory_space<vmem>>, vector<1x1x1x16xf32>
    %64 = vector.shape_cast %63 : vector<1x1x1x16xf32> to vector<1x16xf32>
    %65 = vector.broadcast %64 : vector<1x16xf32> to vector<16x16xf32>
    %66 = arith.addf %62, %65 : vector<16x16xf32>
    %c0_53 = arith.constant 0 : index
    %c5 = arith.constant 5 : index
    %c0_54 = arith.constant 0 : index
    %c0_55 = arith.constant 0 : index
    %67 = vector.load %arg3[%c0_53, %c5, %c0_54, %c0_55] : memref<1x6x32x16xbf16, #tpu.memory_space<vmem>>, vector<1x1x32x16xbf16>
    %68 = vector.shape_cast %67 : vector<1x1x32x16xbf16> to vector<32x16xbf16>
    %cst_56 = arith.constant dense<0.000000e+00> : vector<16x16xf32>
    %69 = tpu.matmul %7, %68, %cst_56 {dimension_numbers = #tpu.dot_dimension_numbers<[1], [0], [0], [1], [0, 0, 1, 1], [], []>} : vector<16x32xbf16>, vector<32x16xbf16>, vector<16x16xf32> -> vector<16x16xf32>
    %c0_57 = arith.constant 0 : index
    %c5_58 = arith.constant 5 : index
    %c0_59 = arith.constant 0 : index
    %c0_60 = arith.constant 0 : index
    %70 = vector.load %arg4[%c0_57, %c5_58, %c0_59, %c0_60] : memref<1x6x1x16xf32, #tpu.memory_space<vmem>>, vector<1x1x1x16xf32>
    %71 = vector.shape_cast %70 : vector<1x1x1x16xf32> to vector<1x16xf32>
    %72 = vector.broadcast %71 : vector<1x16xf32> to vector<16x16xf32>
    %73 = arith.addf %69, %72 : vector<16x16xf32>
    %74 = vector.shape_cast %59 : vector<16x16xf32> to vector<2x8x16xf32>
    %75 = arith.truncf %74 : vector<2x8x16xf32> to vector<2x8x16xbf16>
    %76 = vector.shape_cast %66 : vector<16x16xf32> to vector<2x8x16xf32>
    %77 = arith.truncf %76 : vector<2x8x16xf32> to vector<2x8x16xbf16>
    %78 = vector.shape_cast %73 : vector<16x16xf32> to vector<2x8x16xf32>
    %79 = arith.truncf %78 : vector<2x8x16xf32> to vector<2x8x16xbf16>
    %cst_61 = arith.constant dense<0.000000e+00> : vector<2x8x8xf32>
    %80 = tpu.matmul %75, %77, %cst_61 {dimension_numbers = #tpu.dot_dimension_numbers<[2], [2], [1], [1], [0, 0, 0, 1, 1, 1], [0], [0]>} : vector<2x8x16xbf16>, vector<2x8x16xbf16>, vector<2x8x8xf32> -> vector<2x8x8xf32>
    %cst_62 = arith.constant 2.500000e-01 : f32
    %81 = vector.broadcast %cst_62 : f32 to vector<2x8x8xf32>
    %82 = arith.mulf %80, %81 : vector<2x8x8xf32>
    %83 = vector.broadcast %4 : vector<2x1x8xf32> to vector<2x8x8xf32>
    %84 = arith.addf %82, %83 : vector<2x8x8xf32>
    %cst_63 = arith.constant dense<0xFF800000> : vector<2x8xf32>
    %85 = vector.multi_reduction <maximumf>, %84, %cst_63 [2] : vector<2x8x8xf32> to vector<2x8xf32>
    %86 = vector.shape_cast %85 : vector<2x8xf32> to vector<2x8x1xf32>
    %87 = vector.broadcast %86 : vector<2x8x1xf32> to vector<2x8x8xf32>
    %88 = arith.subf %84, %87 : vector<2x8x8xf32>
    %89 = math.exp %88 : vector<2x8x8xf32>
    %cst_64 = arith.constant dense<0.000000e+00> : vector<2x8xf32>
    %90 = vector.multi_reduction <add>, %89, %cst_64 [2] : vector<2x8x8xf32> to vector<2x8xf32>
    %91 = vector.shape_cast %90 : vector<2x8xf32> to vector<2x8x1xf32>
    %92 = tpu.reciprocal %91 {approx = true} : vector<2x8x1xf32> -> vector<2x8x1xf32>
    %93 = vector.broadcast %92 : vector<2x8x1xf32> to vector<2x8x8xf32>
    %94 = arith.mulf %89, %93 : vector<2x8x8xf32>
    %95 = arith.truncf %94 : vector<2x8x8xf32> to vector<2x8x8xbf16>
    %cst_65 = arith.constant dense<0.000000e+00> : vector<2x8x16xf32>
    %96 = tpu.matmul %95, %79, %cst_65 {dimension_numbers = #tpu.dot_dimension_numbers<[2], [1], [1], [2], [0, 0, 0, 1, 1, 2], [0], [0]>} : vector<2x8x8xbf16>, vector<2x8x16xbf16>, vector<2x8x16xf32> -> vector<2x8x16xf32>
    %97 = vector.shape_cast %96 : vector<2x8x16xf32> to vector<16x16xf32>
    %98 = tpu.concatenate %52, %97 in 1 : vector<16x16xf32>, vector<16x16xf32> -> vector<16x32xf32>
    %99 = arith.truncf %98 : vector<16x32xf32> to vector<16x32xbf16>
    %c0_66 = arith.constant 0 : index
    %c0_67 = arith.constant 0 : index
    %c0_68 = arith.constant 0 : index
    %100 = vector.load %arg5[%c0_66, %c0_67, %c0_68] : memref<1x32x32xbf16, #tpu.memory_space<vmem>>, vector<1x32x32xbf16>
    %101 = vector.shape_cast %100 : vector<1x32x32xbf16> to vector<32x32xbf16>
    %cst_69 = arith.constant dense<0.000000e+00> : vector<16x32xf32>
    %102 = tpu.matmul %99, %101, %cst_69 {dimension_numbers = #tpu.dot_dimension_numbers<[1], [0], [0], [1], [0, 0, 1, 1], [], []>} : vector<16x32xbf16>, vector<32x32xbf16>, vector<16x32xf32> -> vector<16x32xf32>
    %c0_70 = arith.constant 0 : index
    %c0_71 = arith.constant 0 : index
    %c0_72 = arith.constant 0 : index
    %103 = vector.load %arg6[%c0_70, %c0_71, %c0_72] : memref<1x1x32xf32, #tpu.memory_space<vmem>>, vector<1x1x32xf32>
    %104 = vector.shape_cast %103 : vector<1x1x32xf32> to vector<1x32xf32>
    %105 = vector.broadcast %104 : vector<1x32xf32> to vector<16x32xf32>
    %106 = arith.addf %102, %105 : vector<16x32xf32>
    %107 = arith.addf %106, %6 : vector<16x32xf32>
    %cst_73 = arith.constant dense<0.000000e+00> : vector<16xf32>
    %108 = vector.multi_reduction <add>, %107, %cst_73 [1] : vector<16x32xf32> to vector<16xf32>
    %109 = vector.shape_cast %108 : vector<16xf32> to vector<16x1xf32>
    %cst_74 = arith.constant 3.200000e+01 : f32
    %110 = vector.broadcast %cst_74 : f32 to vector<16x1xf32>
    %111 = arith.divf %109, %110 : vector<16x1xf32>
    %112 = vector.broadcast %111 : vector<16x1xf32> to vector<16x32xf32>
    %113 = arith.subf %107, %112 : vector<16x32xf32>
    %114 = arith.mulf %113, %113 : vector<16x32xf32>
    %cst_75 = arith.constant dense<0.000000e+00> : vector<16xf32>
    %115 = vector.multi_reduction <add>, %114, %cst_75 [1] : vector<16x32xf32> to vector<16xf32>
    %116 = vector.shape_cast %115 : vector<16xf32> to vector<16x1xf32>
    %cst_76 = arith.constant 3.200000e+01 : f32
    %117 = vector.broadcast %cst_76 : f32 to vector<16x1xf32>
    %118 = arith.divf %116, %117 : vector<16x1xf32>
    %119 = vector.broadcast %111 : vector<16x1xf32> to vector<16x32xf32>
    %120 = arith.subf %107, %119 : vector<16x32xf32>
    %cst_77 = arith.constant 9.99999974E-6 : f32
    %121 = vector.broadcast %cst_77 : f32 to vector<16x1xf32>
    %122 = arith.addf %118, %121 : vector<16x1xf32>
    %123 = math.rsqrt %122 : vector<16x1xf32>
    %124 = vector.broadcast %123 : vector<16x1xf32> to vector<16x32xf32>
    %125 = arith.mulf %120, %124 : vector<16x32xf32>
    %c0_78 = arith.constant 0 : index
    %c0_79 = arith.constant 0 : index
    %c0_80 = arith.constant 0 : index
    %126 = vector.load %arg7[%c0_78, %c0_79, %c0_80] : memref<1x1x32xf32, #tpu.memory_space<vmem>>, vector<1x1x32xf32>
    %127 = vector.shape_cast %126 : vector<1x1x32xf32> to vector<1x32xf32>
    %128 = vector.broadcast %127 : vector<1x32xf32> to vector<16x32xf32>
    %129 = arith.mulf %125, %128 : vector<16x32xf32>
    %c0_81 = arith.constant 0 : index
    %c0_82 = arith.constant 0 : index
    %c0_83 = arith.constant 0 : index
    %130 = vector.load %arg8[%c0_81, %c0_82, %c0_83] : memref<1x1x32xf32, #tpu.memory_space<vmem>>, vector<1x1x32xf32>
    %131 = vector.shape_cast %130 : vector<1x1x32xf32> to vector<1x32xf32>
    %132 = vector.broadcast %131 : vector<1x32xf32> to vector<16x32xf32>
    %133 = arith.addf %129, %132 : vector<16x32xf32>
    %134 = vector.broadcast %3 : vector<16x1xf32> to vector<16x32xf32>
    %135 = arith.mulf %133, %134 : vector<16x32xf32>
    %136 = vector.shape_cast %135 : vector<16x32xf32> to vector<2x8x32xf32>
    %c0_84 = arith.constant 0 : index
    %c1_85 = arith.constant 1 : index
    %c0_86 = arith.constant 0 : index
    %137 = vector.load %arg16[%c0_84, %c1_85, %c0_86] : memref<2x10x32xf32, #tpu.memory_space<vmem>>, vector<2x8x32xf32>
    tpu.vector_store %arg16[%c0_84, %c1_85, %c0_86], %136 {strides = array<i32>} : memref<2x10x32xf32, #tpu.memory_space<vmem>>, vector<2x8x32xf32>,
    %c0_87 = arith.constant 0 : index
    %c0_88 = arith.constant 0 : index
    %c0_89 = arith.constant 0 : index
    %138 = vector.load %arg16[%c0_87, %c0_88, %c0_89] : memref<2x10x32xf32, #tpu.memory_space<vmem>>, vector<2x8x32xf32>
    %139 = vector.shape_cast %138 : vector<2x8x32xf32> to vector<16x32xf32>
    %140 = arith.truncf %139 : vector<16x32xf32> to vector<16x32xbf16>
    %c0_90 = arith.constant 0 : index
    %c0_91 = arith.constant 0 : index
    %c0_92 = arith.constant 0 : index
    %c0_93 = arith.constant 0 : index
    %141 = vector.load %arg9[%c0_90, %c0_91, %c0_92, %c0_93] : memref<1x3x32x64xbf16, #tpu.memory_space<vmem>>, vector<1x1x32x64xbf16>
    %142 = vector.shape_cast %141 : vector<1x1x32x64xbf16> to vector<32x64xbf16>
    %cst_94 = arith.constant dense<0.000000e+00> : vector<16x64xf32>
    %143 = tpu.matmul %140, %142, %cst_94 {dimension_numbers = #tpu.dot_dimension_numbers<[1], [0], [0], [1], [0, 0, 1, 1], [], []>} : vector<16x32xbf16>, vector<32x64xbf16>, vector<16x64xf32> -> vector<16x64xf32>
    %c0_95 = arith.constant 0 : index
    %c1_96 = arith.constant 1 : index
    %c0_97 = arith.constant 0 : index
    %144 = vector.load %arg16[%c0_95, %c1_96, %c0_97] : memref<2x10x32xf32, #tpu.memory_space<vmem>>, vector<2x8x32xf32>
    %145 = vector.shape_cast %144 : vector<2x8x32xf32> to vector<16x32xf32>
    %146 = arith.truncf %145 : vector<16x32xf32> to vector<16x32xbf16>
    %c0_98 = arith.constant 0 : index
    %c1_99 = arith.constant 1 : index
    %c0_100 = arith.constant 0 : index
    %c0_101 = arith.constant 0 : index
    %147 = vector.load %arg9[%c0_98, %c1_99, %c0_100, %c0_101] : memref<1x3x32x64xbf16, #tpu.memory_space<vmem>>, vector<1x1x32x64xbf16>
    %148 = vector.shape_cast %147 : vector<1x1x32x64xbf16> to vector<32x64xbf16>
    %cst_102 = arith.constant dense<0.000000e+00> : vector<16x64xf32>
    %149 = tpu.matmul %146, %148, %cst_102 {dimension_numbers = #tpu.dot_dimension_numbers<[1], [0], [0], [1], [0, 0, 1, 1], [], []>} : vector<16x32xbf16>, vector<32x64xbf16>, vector<16x64xf32> -> vector<16x64xf32>
    %150 = arith.addf %143, %149 : vector<16x64xf32>
    %c0_103 = arith.constant 0 : index
    %c2_104 = arith.constant 2 : index
    %c0_105 = arith.constant 0 : index
    %151 = vector.load %arg16[%c0_103, %c2_104, %c0_105] : memref<2x10x32xf32, #tpu.memory_space<vmem>>, vector<2x8x32xf32>
    %152 = vector.shape_cast %151 : vector<2x8x32xf32> to vector<16x32xf32>
    %153 = arith.truncf %152 : vector<16x32xf32> to vector<16x32xbf16>
    %c0_106 = arith.constant 0 : index
    %c2_107 = arith.constant 2 : index
    %c0_108 = arith.constant 0 : index
    %c0_109 = arith.constant 0 : index
    %154 = vector.load %arg9[%c0_106, %c2_107, %c0_108, %c0_109] : memref<1x3x32x64xbf16, #tpu.memory_space<vmem>>, vector<1x1x32x64xbf16>
    %155 = vector.shape_cast %154 : vector<1x1x32x64xbf16> to vector<32x64xbf16>
    %cst_110 = arith.constant dense<0.000000e+00> : vector<16x64xf32>
    %156 = tpu.matmul %153, %155, %cst_110 {dimension_numbers = #tpu.dot_dimension_numbers<[1], [0], [0], [1], [0, 0, 1, 1], [], []>} : vector<16x32xbf16>, vector<32x64xbf16>, vector<16x64xf32> -> vector<16x64xf32>
    %157 = arith.addf %150, %156 : vector<16x64xf32>
    %c0_111 = arith.constant 0 : index
    %c0_112 = arith.constant 0 : index
    %c0_113 = arith.constant 0 : index
    %158 = vector.load %arg10[%c0_111, %c0_112, %c0_113] : memref<1x1x64xf32, #tpu.memory_space<vmem>>, vector<1x1x64xf32>
    %159 = vector.shape_cast %158 : vector<1x1x64xf32> to vector<1x64xf32>
    %160 = vector.broadcast %159 : vector<1x64xf32> to vector<16x64xf32>
    %161 = arith.addf %157, %160 : vector<16x64xf32>
    %cst_114 = arith.constant 0.000000e+00 : f32
    %162 = vector.broadcast %cst_114 : f32 to vector<16x64xf32>
    %163 = arith.maximumf %161, %162 : vector<16x64xf32>
    %164 = arith.truncf %163 : vector<16x64xf32> to vector<16x64xbf16>
    %c0_115 = arith.constant 0 : index
    %c0_116 = arith.constant 0 : index
    %c0_117 = arith.constant 0 : index
    %c0_118 = arith.constant 0 : index
    %165 = vector.load %arg11[%c0_115, %c0_116, %c0_117, %c0_118] : memref<1x1x64x32xbf16, #tpu.memory_space<vmem>>, vector<1x1x64x32xbf16>
    %166 = vector.shape_cast %165 : vector<1x1x64x32xbf16> to vector<64x32xbf16>
    %cst_119 = arith.constant dense<0.000000e+00> : vector<16x32xf32>
    %167 = tpu.matmul %164, %166, %cst_119 {dimension_numbers = #tpu.dot_dimension_numbers<[1], [0], [0], [1], [0, 0, 1, 1], [], []>} : vector<16x64xbf16>, vector<64x32xbf16>, vector<16x32xf32> -> vector<16x32xf32>
    %c0_120 = arith.constant 0 : index
    %c0_121 = arith.constant 0 : index
    %c0_122 = arith.constant 0 : index
    %168 = vector.load %arg12[%c0_120, %c0_121, %c0_122] : memref<1x1x32xf32, #tpu.memory_space<vmem>>, vector<1x1x32xf32>
    %169 = vector.shape_cast %168 : vector<1x1x32xf32> to vector<1x32xf32>
    %170 = vector.broadcast %169 : vector<1x32xf32> to vector<16x32xf32>
    %171 = arith.addf %167, %170 : vector<16x32xf32>
    %172 = arith.addf %171, %135 : vector<16x32xf32>
    %cst_123 = arith.constant dense<0.000000e+00> : vector<16xf32>
    %173 = vector.multi_reduction <add>, %172, %cst_123 [1] : vector<16x32xf32> to vector<16xf32>
    %174 = vector.shape_cast %173 : vector<16xf32> to vector<16x1xf32>
    %cst_124 = arith.constant 3.200000e+01 : f32
    %175 = vector.broadcast %cst_124 : f32 to vector<16x1xf32>
    %176 = arith.divf %174, %175 : vector<16x1xf32>
    %177 = vector.broadcast %176 : vector<16x1xf32> to vector<16x32xf32>
    %178 = arith.subf %172, %177 : vector<16x32xf32>
    %179 = arith.mulf %178, %178 : vector<16x32xf32>
    %cst_125 = arith.constant dense<0.000000e+00> : vector<16xf32>
    %180 = vector.multi_reduction <add>, %179, %cst_125 [1] : vector<16x32xf32> to vector<16xf32>
    %181 = vector.shape_cast %180 : vector<16xf32> to vector<16x1xf32>
    %cst_126 = arith.constant 3.200000e+01 : f32
    %182 = vector.broadcast %cst_126 : f32 to vector<16x1xf32>
    %183 = arith.divf %181, %182 : vector<16x1xf32>
    %184 = vector.broadcast %176 : vector<16x1xf32> to vector<16x32xf32>
    %185 = arith.subf %172, %184 : vector<16x32xf32>
    %cst_127 = arith.constant 9.99999974E-6 : f32
    %186 = vector.broadcast %cst_127 : f32 to vector<16x1xf32>
    %187 = arith.addf %183, %186 : vector<16x1xf32>
    %188 = math.rsqrt %187 : vector<16x1xf32>
    %189 = vector.broadcast %188 : vector<16x1xf32> to vector<16x32xf32>
    %190 = arith.mulf %185, %189 : vector<16x32xf32>
    %c0_128 = arith.constant 0 : index
    %c0_129 = arith.constant 0 : index
    %c0_130 = arith.constant 0 : index
    %191 = vector.load %arg13[%c0_128, %c0_129, %c0_130] : memref<1x1x32xf32, #tpu.memory_space<vmem>>, vector<1x1x32xf32>
    %192 = vector.shape_cast %191 : vector<1x1x32xf32> to vector<1x32xf32>
    %193 = vector.broadcast %192 : vector<1x32xf32> to vector<16x32xf32>
    %194 = arith.mulf %190, %193 : vector<16x32xf32>
    %c0_131 = arith.constant 0 : index
    %c0_132 = arith.constant 0 : index
    %c0_133 = arith.constant 0 : index
    %195 = vector.load %arg14[%c0_131, %c0_132, %c0_133] : memref<1x1x32xf32, #tpu.memory_space<vmem>>, vector<1x1x32xf32>
    %196 = vector.shape_cast %195 : vector<1x1x32xf32> to vector<1x32xf32>
    %197 = vector.broadcast %196 : vector<1x32xf32> to vector<16x32xf32>
    %198 = arith.addf %194, %197 : vector<16x32xf32>
    %199 = vector.broadcast %3 : vector<16x1xf32> to vector<16x32xf32>
    %200 = arith.mulf %198, %199 : vector<16x32xf32>
    %201 = vector.shape_cast %200 : vector<16x32xf32> to vector<2x8x32xf32>
    %c0_134 = arith.constant 0 : index
    %c1_135 = arith.constant 1 : index
    %c0_136 = arith.constant 0 : index
    %202 = vector.load %arg16[%c0_134, %c1_135, %c0_136] : memref<2x10x32xf32, #tpu.memory_space<vmem>>, vector<2x8x32xf32>
    tpu.vector_store %arg16[%c0_134, %c1_135, %c0_136], %201 {strides = array<i32>} : memref<2x10x32xf32, #tpu.memory_space<vmem>>, vector<2x8x32xf32>,
    %c0_137 = arith.constant 0 : index
    %c0_138 = arith.constant 0 : index
    %c0_139 = arith.constant 0 : index
    %c0_140 = arith.constant 0 : index
    %203 = vector.load %arg15[%c0_137, %c0_138, %c0_139, %c0_140] : memref<1x2x8x32xf32, #tpu.memory_space<vmem>>, vector<1x2x8x32xf32>
    %204 = vector.shape_cast %203 : vector<1x2x8x32xf32> to vector<2x8x32xf32>
    %205 = vector.shape_cast %201 : vector<2x8x32xf32> to vector<1x2x8x32xf32>
    tpu.vector_store %arg15[%c0_137, %c0_138, %c0_139, %c0_140], %205 {strides = array<i32>} : memref<1x2x8x32xf32, #tpu.memory_space<vmem>>, vector<1x2x8x32xf32>,
    return
  }
  func.func @transform_0(%arg0: i32) -> (i32, i32, i32) {
    %c0_i32 = arith.constant 0 : i32
    %c0_i32_0 = arith.constant 0 : i32
    %c0_i32_1 = arith.constant 0 : i32
    %c0_i32_2 = arith.constant 0 : i32
    return %c0_i32, %c0_i32_0, %c0_i32_1 : i32, i32, i32
  }
  func.func @transform_1(%arg0: i32) -> (i32, i32) {
    %c0_i32 = arith.constant 0 : i32
    %c0_i32_0 = arith.constant 0 : i32
    %c0_i32_1 = arith.constant 0 : i32
    return %c0_i32, %c0_i32_0 : i32, i32
  }
  func.func @transform_2(%arg0: i32) -> (i32, i32, i32, i32) {
    %c0_i32 = arith.constant 0 : i32
    %c0_i32_0 = arith.constant 0 : i32
    %c0_i32_1 = arith.constant 0 : i32
    %c0_i32_2 = arith.constant 0 : i32
    return %arg0, %c0_i32, %c0_i32_0, %c0_i32_1 : i32, i32, i32, i32
  }
  func.func @transform_3(%arg0: i32) -> (i32, i32, i32, i32) {
    %c0_i32 = arith.constant 0 : i32
    %c0_i32_0 = arith.constant 0 : i32
    %c0_i32_1 = arith.constant 0 : i32
    %c0_i32_2 = arith.constant 0 : i32
    return %arg0, %c0_i32, %c0_i32_0, %c0_i32_1 : i32, i32, i32, i32
  }
  func.func @transform_4(%arg0: i32) -> (i32, i32, i32) {
    %c0_i32 = arith.constant 0 : i32
    %c0_i32_0 = arith.constant 0 : i32
    %c0_i32_1 = arith.constant 0 : i32
    return %arg0, %c0_i32, %c0_i32_0 : i32, i32, i32
  }
  func.func @transform_5(%arg0: i32) -> (i32, i32, i32) {
    %c0_i32 = arith.constant 0 : i32
    %c0_i32_0 = arith.constant 0 : i32
    %c0_i32_1 = arith.constant 0 : i32
    return %arg0, %c0_i32, %c0_i32_0 : i32, i32, i32
  }
  func.func @transform_6(%arg0: i32) -> (i32, i32, i32) {
    %c0_i32 = arith.constant 0 : i32
    %c0_i32_0 = arith.constant 0 : i32
    %c0_i32_1 = arith.constant 0 : i32
    return %arg0, %c0_i32, %c0_i32_0 : i32, i32, i32
  }
  func.func @transform_7(%arg0: i32) -> (i32, i32, i32) {
    %c0_i32 = arith.constant 0 : i32
    %c0_i32_0 = arith.constant 0 : i32
    %c0_i32_1 = arith.constant 0 : i32
    return %arg0, %c0_i32, %c0_i32_0 : i32, i32, i32
  }
  func.func @transform_8(%arg0: i32) -> (i32, i32, i32, i32) {
    %c0_i32 = arith.constant 0 : i32
    %c0_i32_0 = arith.constant 0 : i32
    %c0_i32_1 = arith.constant 0 : i32
    %c0_i32_2 = arith.constant 0 : i32
    return %arg0, %c0_i32, %c0_i32_0, %c0_i32_1 : i32, i32, i32, i32
  }
  func.func @transform_9(%arg0: i32) -> (i32, i32, i32) {
    %c0_i32 = arith.constant 0 : i32
    %c0_i32_0 = arith.constant 0 : i32
    %c0_i32_1 = arith.constant 0 : i32
    return %arg0, %c0_i32, %c0_i32_0 : i32, i32, i32
  }
  func.func @transform_10(%arg0: i32) -> (i32, i32, i32, i32) {
    %c0_i32 = arith.constant 0 : i32
    %c0_i32_0 = arith.constant 0 : i32
    %c0_i32_1 = arith.constant 0 : i32
    %c0_i32_2 = arith.constant 0 : i32
    return %arg0, %c0_i32, %c0_i32_0, %c0_i32_1 : i32, i32, i32, i32
  }
  func.func @transform_11(%arg0: i32) -> (i32, i32, i32) {
    %c0_i32 = arith.constant 0 : i32
    %c0_i32_0 = arith.constant 0 : i32
    %c0_i32_1 = arith.constant 0 : i32
    return %arg0, %c0_i32, %c0_i32_0 : i32, i32, i32
  }
  func.func @transform_12(%arg0: i32) -> (i32, i32, i32) {
    %c0_i32 = arith.constant 0 : i32
    %c0_i32_0 = arith.constant 0 : i32
    %c0_i32_1 = arith.constant 0 : i32
    return %arg0, %c0_i32, %c0_i32_0 : i32, i32, i32
  }
  func.func @transform_13(%arg0: i32) -> (i32, i32, i32) {
    %c0_i32 = arith.constant 0 : i32
    %c0_i32_0 = arith.constant 0 : i32
    %c0_i32_1 = arith.constant 0 : i32
    return %arg0, %c0_i32, %c0_i32_0 : i32, i32, i32
  }
  func.func @transform_14(%arg0: i32) -> (i32, i32, i32, i32) {
    %c0_i32 = arith.constant 0 : i32
    %c0_i32_0 = arith.constant 0 : i32
    %c0_i32_1 = arith.constant 0 : i32
    %c0_i32_2 = arith.constant 0 : i32
    return %arg0, %c0_i32, %c0_i32_0, %c0_i32_1 : i32, i32, i32, i32
  }
}

</mosaic_0001>

<bundles_post_ra>
// kernel: tpu_custom_call.1
= control target key start
LH: loop header
LB: loop body
LE: loop exit
PB: predicated region body
PF: predicated region fallthrough
CT: control target
= control target key end

     0   :  { %s3217_s0 = inlined_call_operand.vmem [shape: f32[2,8,32], index: 0, kind: input, shape index: {}]   ;;  %s3218_s1 = inlined_call_operand.vmem [shape: s32[2,1], index: 1, kind: input, shape index: {}]   ;;  %s3219_s2 = inlined_call_operand.vmem [shape: bf16[2,6,32,16], index: 2, kind: input, shape index: {}]   ;;  %s3220_s3 = inlined_call_operand.vmem [shape: f32[2,6,1,16], index: 3, kind: input, shape index: {}]   ;;  %s3221_s4 = inlined_call_operand.vmem [shape: bf16[2,32,32], index: 4, kind: input, shape index: {}]   ;;  %s3222_s5 = inlined_call_operand.vmem [shape: f32[2,1,32], index: 5, kind: input, shape index: {}]   ;;  %s3223_s6 = inlined_call_operand.vmem [shape: f32[2,1,32], index: 6, kind: input, shape index: {}]   ;;  %s3224_s7 = inlined_call_operand.vmem [shape: f32[2,1,32], index: 7, kind: input, shape index: {}]   ;;  %s3225_s8 = inlined_call_operand.vmem [shape: bf16[2,3,32,64], index: 8, kind: input, shape index: {}]   ;;  %s3226_s9 = inlined_call_operand.vmem [shape: f32[2,1,64], index: 9, kind: input, shape index: {}]   ;;  %s3227_s10 = inlined_call_operand.vmem [shape: bf16[2,1,64,32], index: 10, kind: input, shape index: {}]   ;;  %s3228_s11 = inlined_call_operand.vmem [shape: f32[2,1,32], index: 11, kind: input, shape index: {}]   ;;  %s3229_s12 = inlined_call_operand.vmem [shape: f32[2,1,32], index: 12, kind: input, shape index: {}]   ;;  %s3230_s13 = inlined_call_operand.vmem [shape: f32[2,1,32], index: 13, kind: input, shape index: {}]   ;;  %s3231_s14 = inlined_call_operand.hbm [shape: f32[2,2,8,32], index: 14, kind: output, shape index: {}]  }
   0x1   :  { %3245 = sst [smem:[#allocation17_spill]] %s3217_s0 }
   0x2   :  { %3246 = sst [smem:[#allocation18_spill]] %s3218_s1 }
   0x3   :  { %3247 = sst [smem:[#allocation19_spill]] %s3219_s2 }
   0x4   :  { %3248 = sst [smem:[#allocation20_spill]] %s3220_s3 }
   0x5   :  { %3249 = sst [smem:[#allocation21_spill]] %s3221_s4 }
   0x6   :  { %3250 = sst [smem:[#allocation22_spill]] %s3231_s14 }
   0x7   :  { %19 = vsyncpa [#allocation6], 0 }
   0x8   :  { %21 = vsyncpa [#allocation6 + $0x1], 0  ;;  %s2807_s29 = smov 0   ;;  %s2809_s30 = smov 0  }
   0x9   :  { %s2811_s15 = smov 0   ;;  %s2813_s16 = smov 0  }
   0xa LB: > { %3251 = sst [smem:[#allocation8_spill]] %s2707_s29  ;;  %s2828_s17 = sadd.s32 4294967295, %s2719_s16   ;;  %s2719_s16 = sphi %s2813_s16, %s3281_s16   ;;  %s2715_s15 = sphi %s2811_s15, %s3284_s15   ;;  %s2711_s30 = sphi %s2809_s30, %s3283_s30   ;;  %s2707_s29 = sphi %s2807_s29, %s3282_s29  }
   0xb   : > { %3252 = sst [smem:[#allocation9_spill]] %s2711_s30  ;;  %s2244_s18 = sadd.s32 4294967294, %s2719_s16  }
   0xc   : > { %3253 = sst [smem:[#allocation10_spill]] %s2715_s15  ;;  %s2832_s19 = sadd.s32 1, %s2719_s16  }
   0xd   : > { %3254 = sst [smem:[#allocation11_spill]] %s2719_s16  ;;  %s388_s20 = sadd.s32 1, %s2715_s15 }
   0xe   : > { %3255 = sst [smem:[#allocation12_spill]] %s2828_s17  ;;  %s385_s21 = ssub.s32 %s2719_s16, %s2832_s19 }
   0xf   : > { %3256 = sst [smem:[#allocation13_spill]] %s2832_s19  ;;  %p398_p0 = scmp.ne.s32.totalorder %s2715_s15, %s2711_s30 }
  0x10   : > { %p386_p1 = scmp.eq.s32.totalorder %s385_s21, 0  ;;  %p399_p2 = scmp.eq.s32.totalorder %s2828_s17, 1 }
  0x11   : > { %p404_p3 = scmp.ne.s32.totalorder %s2711_s30, %s2707_s29  ;;  %p405_p4 = scmp.eq.s32.totalorder %s2244_s18, 1 }
  0x12   : > { %s2843_s22 = scalar_select %p386_p1, %s2715_s15, %s388_s20  }
  0x13   : > { %p2845_p5 = por %p399_p2, %p398_p0  ;;  %p2849_p6 = por %p405_p4, %p404_p3 }
  0x14   : > { %3257 = sst [smem:[#allocation14_spill]] %s2843_s22  ;;  %p2247_p7 = scmp.ge.s32.totalorder %s2719_s16, 1 }
  0x15   : > { %s3258_s23 = scalar_select %p2845_p5, 1, 0 }
  0x16   : > { %s3260_s24 = scalar_select %p2849_p6, 1, 0 }
  0x17   : > { %3259 = sst [smem:[#allocation15_spill]] %s3258_s23  ;;  %p510_p8 = scmp.lt.s32.totalorder %s2719_s16, 3 }
  0x18   : > { %3261 = sst [smem:[#allocation16_spill]] %s3260_s24 }
  0x19   : > { %p511_p9 = pnand %p2247_p7, %p510_p8 }
  0x1a   : > { %s3232_s25 = sand.u32 (!%p511_p9), 1, %s2711_s30   ;;  %p596_p10 = scmp.lt.s32.totalorder (!%p511_p9), %s2828_s17, 1 }
  0x1b   : > { %514 = sbr.rel (%p511_p9) target bundleno = 3397 (0xd45), region = 76  ;;  %s2248_s26 = sshll.u32 (!%p511_p9), %s3232_s25, 4 }
  0x1c   : > { %s3262_s4 = sld [smem:[#allocation21_spill]] (!%p511_p9)  ;;  %s3263_s2 = sld [smem:[#allocation19_spill]] (!%p511_p9) }
  0x1d   : > { %s3264_s3 = sld [smem:[#allocation20_spill]] (!%p511_p9)  ;;  %s2920_s14 = scalar_lea.vmem (!%p511_p9), [#allocation5], %s2248_s26 }
  0x22   : > { %s2860_s27 = scalar_select %p596_p10, %s2828_s17, 1 }
  0x24   : > { %s2549_s28 = smul.u32 96, %s2860_s27  ;;  %s2355_s18 = sshll.u32 %s2860_s27, 4 }
  0x25   : > { %s2550_s20 = smul.u32 6, %s2860_s27  ;;  %s2868_s25 = scalar_lea.vmem %s3262_s4, %s2355_s18 }
  0x26   : > { %s2873_s24 = scalar_lea.vmem %s3263_s2, %s2549_s28  ;;  %s2551_s15 = smul.u32 48, %s2860_s27 }
  0x27   : > { %s2882_s1 = scalar_lea.vmem %s3264_s3, %s2550_s20  ;;  %s2356_s29 = sshll.u32 %s2860_s27, 5 }
  0x28   : > { %s2901_s30 = scalar_lea.vmem %s3225_s8, %s2551_s15  ;;  %s2906_s0 = scalar_lea.vmem %s3227_s10, %s2356_s29 }
  0x29   : > { %s634_s18 = scalar_lea.vmem %s3228_s11, %s2860_s27  ;;  %s637_s19 = scalar_lea.vmem %s3229_s12, %s2860_s27 }
  0x2a   : > { %s640_s3 = scalar_lea.vmem %s3230_s13, %s2860_s27  ;;  %s3265_s15 = sld [smem:[#allocation12_spill]] }
  0x30   : > { %p2255_p11 = scmp.ne.s32.totalorder %s3265_s15, 0 }
  0x31   : > { %v668_v0 = vlaneseq (!%p2255_p11)  ;;  %v2721_v1 = vmov (!%p2255_p11), 0   ;;  %vm646_vm0 = vcmask (!%p2255_p11), 261120   ;;  %vm648_vm1 = vcmask (!%p2255_p11), 254976   ;;  %s3266_s16 = sld [smem:[#allocation17_spill]] (!%p2255_p11)  ;;  %s3268_s17 = sld [smem:[#allocation18_spill]] (!%p2255_p11) }
  0x32   : > { %645 = sbr.rel (%p2255_p11) target bundleno = 196 (0xc4), region = 80  ;;  %2601 = vset.pattern.permute.xlu0 (!%p2255_p11), %v2721_v1  ;;  %v2722_v3 = vmov (!%p2255_p11), 1966171168   ;;  %v2723_v6 = vmov (!%p2255_p11), 0.0   ;;  %vm695_vm2 = vcmask (!%p2255_p11), 7168   ;;  %vm718_vm5 = vcmask (!%p2255_p11), 57344  }
  0x33   : > { %v666_v4 = vunpack.c.l.s4 (!%p2255_p11), %v2722_v3  ;;  %v669_v5 = vshrl.u32 (!%p2255_p11), %v668_v0, 7  ;;  %647 = vst.msk [vmem:[#allocation2] sm:$0xff] (!%p2255_p11), %vm646_vm0, %v2723_v6  ;;  %650 = vst.msk [vmem:[#allocation2 + $0x10] sm:$0xff] (!%p2255_p11), %vm646_vm0, %v2723_v6  ;;  %v699_v19 = vand.u32 (!%p2255_p11), 127, %v668_v0  ;;  %v2724_v22 = vmov (!%p2255_p11), -1e+09  }
  0x34   : > { %649 = vst.msk [vmem:[#allocation2 + $0x8] sm:$0x3] (!%p2255_p11), %vm648_vm1, %v2723_v6  ;;  %651 = vst.msk [vmem:[#allocation2 + $0x18] sm:$0x3] (!%p2255_p11), %vm648_vm1, %v2723_v6 }
  0x35   : > { %v667_v9 = vunpack.c.0.s8 (!%p2255_p11), %v666_v4  ;;  %v683_v13 = vsub.s32 (!%p2255_p11), 0, %v669_v5 }
  0x37   : > { %s3267_s23 = smov (!%p2255_p11), %s3266_s16  ;;  %v652_v2 = vld [vmem:[%s3266_s16] sm:$0xff] (!%p2255_p11)  ;;  %v670_v11 = vsub.s32 (!%p2255_p11), %v667_v9, %v669_v5 }
  0x38   : > { %v653_v7 = vld [vmem:[%s3267_s23 + $0x8] sm:$0xff] (!%p2255_p11)  ;;  %v2256_v8 = vld.sshfl [vmem:[%s3268_s17] sm:$0x11 pattern:$0x75316420] (!%p2255_p11)  ;;  %654 = vst.msk [vmem:[#allocation2 + $0x1] sm:$0xff] (!%p2255_p11), %vm646_vm0, %v652_v2 }
  0x39   : > { %655 = vst.msk [vmem:[#allocation2 + $0x11] sm:$0xff] %vm646_vm0, %v653_v7  ;;  %v664_v10 = vcombine.high %v2256_v8, %v2256_v8  ;;  %v671_v12 = vrot.slane %v2256_v8, %v670_v11 }
  0x3b   : > { %v678_v14 = vrot.slane %v664_v10, %v670_v11  ;;  %701 = vperm.xlu0 %2601, %v671_v12   ;;  %v684_v15 = vrot.slane %v671_v12, %v683_v13 }
  0x3d   : > { %v688_v16 = vrot.slane %v678_v14, %v683_v13  ;;  %vm689_vm3 = vcmp.lt.s32.totalorder %v669_v5, %v684_v15 }
  0x3e   : > { %v2257_v17 = vsel %vm689_vm3, 1.0, %v2723_v6 }
  0x3f   : > { %vm690_vm4 = vcmp.lt.s32.totalorder %v669_v5, %v688_v16  ;;  %696 = vst.msk [vmem:[#allocation3] sm:$0xff] %vm695_vm2, %v2257_v17  ;;  %708 = vperm.xlu0 %2601, %v678_v14  }
  0x40   : > { %v2258_v18 = vsel %vm690_vm4, 1.0, %v2723_v6 }
  0x41   : > { %697 = vst.msk [vmem:[#allocation3 + $0x8] sm:$0xff] %vm695_vm2, %v2258_v18 }
  0xba   : > { %v702_v20 = vpop.permute.xlu0 %701 }
  0xbb   : > { %v706_v21 = vrot.slane %v702_v20, %v683_v13 }
  0xbd   : > { %vm714_vm6 = vcmp.lt.s32.totalorder %v699_v19, %v706_v21 }
  0xbe   : > { %v716_v23 = vsel %vm714_vm6, 0.0, %v2724_v22  ;;  %v709_v24 = vpop.permute.xlu0 %708 }
  0xbf   : > { %719 = vst.msk [vmem:[#allocation4] sm:$0x1] %vm718_vm5, %v716_v23  ;;  %v713_v25 = vrot.slane %v709_v24, %v683_v13 }
  0xc1   : > { %vm715_vm7 = vcmp.lt.s32.totalorder %v699_v19, %v713_v25 }
  0xc2   : > { %v717_v26 = vsel %vm715_vm7, 0.0, %v2724_v22 }
  0xc3   : > { %720 = vst.msk [vmem:[#allocation4 + $0x1] sm:$0x1] %vm718_vm5, %v717_v26 }
  0xc4 PF: > { %v2609_v27 = vld [vmem:[%s2873_s24] sm:$0xff]   ;;  %v2725_v28 = vmov 0.0   ;;  %v2610_v29 = vld [vmem:[%s2873_s24 + $0x8] sm:$0xff]   ;;  %vm2726_vm8 = vmmov 0   ;;  %vm751_vm9 = vcmask 261120   ;;  %vm934_vm10 = vcmask 130048   ;;  %s3269_s21 = scalar_lea.vmem %s3222_s5, %s2860_s27  ;;  %s3270_s22 = scalar_lea.vmem %s3223_s6, %s2860_s27 }
  0xc5   : > { %2409 = vmatprep.subr.bf16.mxu1 %v2725_v28  ;;  %2425 = vmatprep.subr.bf16.mxu0 %v2725_v28  ;;  %v2611_v32 = vld [vmem:[%s2873_s24 + $0x20] sm:$0xff]   ;;  %v2612_v34 = vld [vmem:[%s2873_s24 + $0x28] sm:$0xff]   ;;  %vm1071_vm11 = vcmask 1043456   ;;  %vm1043_vm12 = vcmask 64512   ;;  %s3271_s2 = scalar_lea.vmem %s3224_s7, %s2860_s27  ;;  %s3272_s26 = scalar_lea.vmem %s3226_s9, %s2860_s27  ;;  %vm1960_vm13 = vcmask 523264  }
  0xc6   : > { %2410 = vmatpush3.bf16.msra.mxu1 %v2609_v27  ;;  %2413 = vmatprep.mubr.msk.bf16.mxu1 %vm2726_vm8, %v2725_v28  ;;  %v2613_v35 = vld [vmem:[%s2873_s24 + $0x40] sm:$0xff]   ;;  %v2614_v36 = vld [vmem:[%s2873_s24 + $0x48] sm:$0xff]   ;;  %v2989_v14 = vld [vmem:[#allocation4] ss:$0 sm:$0xff]  ;;  %s2729_s4 = smov [#allocation5]  }
  0xc7   : > { %2411 = vmatprep.subr.bf16.mxu1 %v2725_v28  ;;  %2429 = vmatprep.mubr.msk.bf16.mxu0 %vm2726_vm8, %v2725_v28  ;;  %v2268_v41 = vld [vmem:[%s2882_s1 + $0x2] ss:$0 sm:$0xff]  ;;  %v2259_v49 = vld [vmem:[%s2882_s1] ss:$0 sm:$0xff]  ;;  %v2277_v57 = vld [vmem:[%s2882_s1 + $0x4] ss:$0 sm:$0xff] }
  0xc8   : > { %2426 = vmatpush3.bf16.msra.mxu0 %v2613_v35 }
  0xc9   : > { %2427 = vmatprep.subr.bf16.mxu0 %v2725_v28 }
  0xca   : > { %v2938_v30 = vld [vmem:[#allocation2 + $0x1] sm:$0xff]  ;;  %2412 = vmatpush3.bf16.msra.mxu1 %v2610_v29  ;;  %v2987_v8 = vld [vmem:[#allocation4 + $0x1] ss:$0 sm:$0xff] }
  0xcb   : > { %v2940_v31 = vld [vmem:[#allocation2 + $0x11] sm:$0xff]  ;;  %2417 = vmatprep.subr.bf16.mxu1 %v2725_v28 }
  0xcc   : > { %v2948_v33 = vpack.c.bf16 %v2940_v31, %v2938_v30  ;;  %2428 = vmatpush3.bf16.msra.mxu0 %v2614_v36 }
  0xcd   : > { %2439 = vmatprep.subr.bf16.mxu0 %v2725_v28 }
  0xce   : > { %2414 = vmatmul.mubr.msk.bf16.vlgmr.msra.gmra.mrb[0].mxu1 %vm751_vm9, %v2948_v33 }
  0xcf   : > { %2418 = vmatpush3.bf16.msra.mxu1 %v2611_v32  ;;  %2421 = vmatprep.mubr.msk.bf16.mxu1 %vm2726_vm8, %v2725_v28 }
  0xd0   : > { %2419 = vmatprep.subr.bf16.mxu1 %v2725_v28  ;;  %2430 = vmatmul.mubr.msk.bf16.vlgmr.msra.gmra.mrb[0].mxu0 %vm751_vm9, %v2948_v33 }
  0xd1   : > { %2441 = vmatprep.mubr.msk.bf16.mxu0 %vm2726_vm8, %v2725_v28 }
  0xd3   : > { %2420 = vmatpush3.bf16.msra.mxu1 %v2612_v34 }
  0xd4   : > { %2433 = vmatprep.subr.bf16.mxu1 %v2725_v28 }
  0xd6   : > { %2422 = vmatmul.mubr.msk.bf16.vlgmr.msra.gmra.mrb[4].mxu1 %vm751_vm9, %v2948_v33 }
  0xd7   : > { %2435 = vmatprep.mubr.msk.bf16.mxu1 %vm2726_vm8, %v2725_v28 }
 0x1a1   : > { %v789_v37 = vpop.f32.mrb[0].mxu1 }
 0x1a2   : > { %v2415_v38 = vpop.f32.mrb[1].mxu1  ;;  %v790_v52 = vadd.f32 %v2259_v49, %v789_v37 }
 0x1a3   : > { %v792_v39 = vpop.f32.mrb[2].mxu1  ;;  %v921_v58 = vpop.f32.mrb[0].mxu0  ;;  %v2615_v38 = vld [vmem:[%s2873_s24 + $0x30] sm:$0xff]  }
 0x1a4   : > { %v2416_v40 = vpop.f32.mrb[3].mxu1  ;;  %v793_v54 = vadd.f32 %v2259_v49, %v792_v39  ;;  %v928_v55 = vpack.c.bf16 %v790_v52, %v790_v52  ;;  %v922_v59 = vadd.f32 %v2277_v57, %v921_v58  ;;  %v2431_v60 = vpop.f32.mrb[1].mxu0 }
 0x1a5   : > { %v924_v61 = vpop.f32.mrb[2].mxu0 }
 0x1a6   : > { %v929_v56 = vpack.c.bf16 %v793_v54, %v793_v54  ;;  %v932_v62 = vpack.c.bf16 %v922_v59, %v922_v59  ;;  %v925_v63 = vadd.f32 %v2277_v57, %v924_v61  ;;  %v2432_v0 = vpop.f32.mrb[3].mxu0  ;;  %v2292_v61 = vld [vmem:[%s2882_s1 + $0x1] ss:$0 sm:$0xff] }
 0x1a8   : > { %v1073_v1 = vsel %vm1071_vm11, %v932_v62, 0  ;;  %v933_v2 = vpack.c.bf16 %v925_v63, %v925_v63 }
 0x1a9   : > { %v855_v42 = vpop.f32.mrb[4].mxu1 }
 0x1aa   : > { %v856_v43 = vadd.f32 %v2268_v41, %v855_v42  ;;  %v2423_v44 = vpop.f32.mrb[5].mxu1  ;;  %v1119_v3 = vsel %vm1071_vm11, %v933_v2, 0  ;;  %v2616_v42 = vld [vmem:[%s2873_s24 + $0x38] sm:$0xff]  }
 0x1ab   : > { %v858_v45 = vpop.f32.mrb[6].mxu1 }
 0x1ac   : > { %v930_v46 = vpack.c.bf16 %v856_v43, %v856_v43  ;;  %v859_v47 = vadd.f32 %v2268_v41, %v858_v45  ;;  %v2424_v48 = vpop.f32.mrb[7].mxu1  ;;  %v2617_v43 = vld [vmem:[%s2873_s24 + $0x10] sm:$0xff]   ;;  %v2618_v45 = vld [vmem:[%s2873_s24 + $0x18] sm:$0xff]  }
 0x1ae   : > { %v939_v50 = vsel %vm934_vm10, %v930_v46, 0  ;;  %v931_v51 = vpack.c.bf16 %v859_v47, %v859_v47  ;;  %v2619_v46 = vld [vmem:[%s2873_s24 + $0x50] sm:$0xff]   ;;  %v2620_v47 = vld [vmem:[%s2873_s24 + $0x58] sm:$0xff]  }
 0x1af   : > { %2434 = vmatpush3.bf16.xpose.msra.mxu1 %v939_v50 }
 0x1b0   : > { %v985_v53 = vsel %vm934_vm10, %v931_v51, 0  ;;  %2445 = vmatprep.subr.bf16.mxu1 %v2725_v28 }
 0x1b1   : > { %2440 = vmatpush3.bf16.xpose.msra.mxu0 %v985_v53 }
 0x1b2   : > { %2451 = vmatprep.subr.bf16.mxu0 %v2725_v28 }
 0x1b6   : > { %2436 = vmatmul.mubr.msk.bf16.vlgmr.msra.gmra.mrb[8].mxu1 %vm934_vm10, %v928_v55  ;;  %v2301_v55 = vld [vmem:[%s2882_s1 + $0x3] ss:$0 sm:$0xff] }
 0x1b7   : > { %2447 = vmatprep.mubr.msk.bf16.mxu1 %vm2726_vm8, %v2725_v28  ;;  %2446 = vmatpush3.bf16.msra.mxu1 %v1073_v1 }
 0x1b8   : > { %2442 = vmatmul.mubr.msk.bf16.vlgmr.msra.gmra.mrb[4].mxu0 %vm934_vm10, %v929_v56  ;;  %2457 = vmatprep.subr.bf16.mxu1 %v2725_v28 }
 0x1b9   : > { %2453 = vmatprep.mubr.msk.bf16.mxu0 %vm2726_vm8, %v2725_v28  ;;  %2452 = vmatpush3.bf16.msra.mxu0 %v1119_v3 }
 0x1ba   : > { %2465 = vmatprep.subr.bf16.mxu0 %v2725_v28 }
 0x289   : > { %v975_v4 = vpop.f32.mrb[8].mxu1 }
 0x28a   : > { %v2437_v5 = vpop.f32.mrb[9].mxu1  ;;  %v1027_v9 = vmul.f32 0.25, %v975_v4 }
 0x28b   : > { %v978_v6 = vpop.f32.mrb[10].mxu1  ;;  %v1021_v7 = vpop.f32.mrb[4].mxu0 }
 0x28c   : > { %v1028_v10 = vmul.f32 0.25, %v1021_v7  ;;  %v2438_v11 = vpop.f32.mrb[11].mxu1  ;;  %v2443_v12 = vpop.f32.mrb[5].mxu0  ;;  %v1041_v18 = vadd.f32 %v2989_v14, %v1027_v9 }
 0x28d   : > { %v1024_v13 = vpop.f32.mrb[6].mxu0  ;;  %v2310_v12 = vld [vmem:[%s2882_s1 + $0x5] ss:$0 sm:$0xff]  ;;  %s2727_s1 = smov 16  }
 0x28e   : > { %v2444_v15 = vpop.f32.mrb[7].mxu0  ;;  %v1042_v16 = vadd.f32 %v2987_v8, %v1028_v10  ;;  %v1044_v19 = vsel %vm1043_vm12, %v1041_v18, -inf }
 0x290   : > { %v1047_v17 = vsel %vm1043_vm12, %v1042_v16, -inf }
 0x291   : > { %1048 = vmax.xlane.f32.xlu0 %v1047_v17 }
 0x295   : > { %1045 = vmax.xlane.f32.xlu0 %v1044_v19 }
 0x31e   : > { %v1049_v20 = vpop.xlane.xlu0 %1048 }
 0x31f   : > { %v1051_v21 = vsub.f32 %v1042_v16, %v1049_v20 }
 0x321   : > { %v1054_v22 = vmul.f32 1.442695, %v1051_v21 }
 0x322   : > { %v1046_v23 = vpop.xlane.xlu0 %1045 }
 0x323   : > { %2633 = vpow2.f32 %v1054_v22  ;;  %v1050_v24 = vsub.f32 %v1041_v18, %v1046_v23 }
 0x325   : > { %v1052_v25 = vmul.f32 1.442695, %v1050_v24 }
 0x327   : > { %2635 = vpow2.f32 %v1052_v25 }
 0x32d   : > { %v2634_v26 = vpop.eup %2633 }
 0x32e   : > { %v1059_v27 = vsel %vm1043_vm12, %v2634_v26, 0.0 }
 0x32f   : > { %1060 = vadd.xlane.f32.xlu1 %v1059_v27 }
 0x331   : > { %v2636_v29 = vpop.eup %2635 }
 0x332   : > { %v1056_v32 = vsel %vm1043_vm12, %v2636_v29, 0.0 }
 0x333   : > { %1057 = vadd.xlane.f32.xlu1 %v1056_v32 }
 0x3bc   : > { %v1061_v34 = vpop.xlane.xlu1 %1060 }
 0x3bd   : > { %2637 = vrcp.f32 %v1061_v34 }
 0x3c0   : > { %v1058_v35 = vpop.xlane.xlu1 %1057 }
 0x3c1   : > { %2639 = vrcp.f32 %v1058_v35 }
 0x3c7   : > { %v2638_v36 = vpop.eup %2637 }
 0x3c8   : > { %v1065_v37 = vmul.f32 %v2638_v36, %v2634_v26 }
 0x3ca   : > { %v1067_v39 = vpack.c.bf16 %v1065_v37, %v1065_v37 }
 0x3cb   : > { %v2640_v40 = vpop.eup %2639 }
 0x3cc   : > { %v1064_v41 = vmul.f32 %v2640_v40, %v2636_v29  ;;  %2454 = vmatmul.mubr.msk.bf16.vlgmr.msra.gmra.mrb[8].mxu0 %vm1043_vm12, %v1067_v39 }
 0x3cd   : > { %2466 = vmatpush3.bf16.msra.mxu0 %v2615_v38  ;;  %2469 = vmatprep.mubr.msk.bf16.mxu0 %vm2726_vm8, %v2725_v28 }
 0x3ce   : > { %v1066_v44 = vpack.c.bf16 %v1064_v41, %v1064_v41  ;;  %2467 = vmatprep.subr.bf16.mxu0 %v2725_v28 }
 0x3d0   : > { %2448 = vmatmul.mubr.msk.bf16.vlgmr.msra.gmra.mrb[12].mxu1 %vm1043_vm12, %v1066_v44 }
 0x3d1   : > { %2468 = vmatpush3.bf16.msra.mxu0 %v2616_v42  ;;  %2458 = vmatpush3.bf16.msra.mxu1 %v2617_v43 }
 0x3d2   : > { %2459 = vmatprep.subr.bf16.mxu1 %v2725_v28  ;;  %2461 = vmatprep.mubr.msk.bf16.mxu1 %vm2726_vm8, %v2725_v28 }
 0x3d3   : > { %2481 = vmatprep.subr.bf16.mxu0 %v2725_v28 }
 0x3d4   : > { %2470 = vmatmul.mubr.msk.bf16.vlgmr.msra.gmra.mrb[12].mxu0 %vm751_vm9, %v2948_v33 }
 0x3d5   : > { %2460 = vmatpush3.bf16.msra.mxu1 %v2618_v45  ;;  %2483 = vmatprep.mubr.msk.bf16.mxu0 %vm2726_vm8, %v2725_v28 }
 0x3d6   : > { %2473 = vmatprep.subr.bf16.mxu1 %v2725_v28 }
 0x3d8   : > { %2462 = vmatmul.mubr.msk.bf16.vlgmr.msra.gmra.mrb[16].mxu1 %vm751_vm9, %v2948_v33 }
 0x3d9   : > { %2477 = vmatprep.mubr.msk.bf16.mxu1 %vm2726_vm8, %v2725_v28  ;;  %2474 = vmatpush3.bf16.msra.mxu1 %v2619_v46 }
 0x3da   : > { %2475 = vmatprep.subr.bf16.mxu1 %v2725_v28 }
 0x3dd   : > { %2476 = vmatpush3.bf16.msra.mxu1 %v2620_v47 }
 0x3de   : > { %2487 = vmatprep.subr.bf16.mxu1 %v2725_v28 }
 0x3e0   : > { %2478 = vmatmul.mubr.msk.bf16.vlgmr.msra.gmra.mrb[20].mxu1 %vm751_vm9, %v2948_v33 }
 0x3e1   : > { %2489 = vmatprep.mubr.msk.bf16.mxu1 %vm2726_vm8, %v2725_v28 }
 0x49f   : > { %v3027_v48 = vpop.f32.mrb[8].mxu0 }
 0x4a0   : > { %v2455_v49 = vpop.f32.mrb[9].mxu0 }
 0x4a1   : > { %v1158_v50 = vpop.f32.mrb[10].mxu0 }
 0x4a2   : > { %v2456_v51 = vpop.f32.mrb[11].mxu0 }
 0x4a3   : > { %v3029_v52 = vpop.f32.mrb[12].mxu1 }
 0x4a4   : > { %v2449_v53 = vpop.f32.mrb[13].mxu1 }
 0x4a5   : > { %v1112_v54 = vpop.f32.mrb[14].mxu1 }
 0x4a6   : > { %v2450_v56 = vpop.f32.mrb[15].mxu1 }
 0x4a7   : > { %v1286_v57 = vpop.f32.mrb[12].mxu0 }
 0x4a8   : > { %v1287_v58 = vadd.f32 %v2301_v55, %v1286_v57  ;;  %v2471_v59 = vpop.f32.mrb[13].mxu0 }
 0x4a9   : > { %v1289_v60 = vpop.f32.mrb[14].mxu0 }
 0x4aa   : > { %v1361_v33 = vpack.c.bf16 %v1287_v58, %v1287_v58  ;;  %v1290_v62 = vadd.f32 %v2301_v55, %v1289_v60  ;;  %v2472_v63 = vpop.f32.mrb[15].mxu0  ;;  %v2621_v60 = vld [vmem:[%s2868_s25] sm:$0xff]  }
 0x4ab   : > { %v1220_v0 = vpop.f32.mrb[16].mxu1 }
 0x4ac   : > { %v1369_v1 = vsel %vm934_vm10, %v1361_v33, 0  ;;  %v1362_v2 = vpack.c.bf16 %v1290_v62, %v1290_v62  ;;  %v1221_v3 = vadd.f32 %v2292_v61, %v1220_v0  ;;  %v2463_v4 = vpop.f32.mrb[17].mxu1 }
 0x4ad   : > { %2482 = vmatpush3.bf16.xpose.msra.mxu0 %v1369_v1  ;;  %v1223_v5 = vpop.f32.mrb[18].mxu1 }
 0x4ae   : > { %v1415_v6 = vsel %vm934_vm10, %v1362_v2, 0  ;;  %v2464_v7 = vpop.f32.mrb[19].mxu1  ;;  %2493 = vmatprep.subr.bf16.mxu0 %v2725_v28  ;;  %v1359_v9 = vpack.c.bf16 %v1221_v3, %v1221_v3  ;;  %v1224_v10 = vadd.f32 %v2292_v61, %v1223_v5  ;;  %v2622_v61 = vld [vmem:[%s2868_s25 + $0x8] sm:$0xff]  }
 0x4af   : > { %2488 = vmatpush3.bf16.xpose.msra.mxu1 %v1415_v6 }
 0x4b0   : > { %2499 = vmatprep.subr.bf16.mxu1 %v2725_v28  ;;  %v1360_v11 = vpack.c.bf16 %v1224_v10, %v1224_v10 }
 0x4b3   : > { %v1352_v13 = vpop.f32.mrb[20].mxu1 }
 0x4b4   : > { %2484 = vmatmul.mubr.msk.bf16.vlgmr.msra.gmra.mrb[16].mxu0 %vm934_vm10, %v1359_v9  ;;  %v1353_v15 = vadd.f32 %v2310_v12, %v1352_v13  ;;  %v2479_v16 = vpop.f32.mrb[21].mxu1  ;;  %v2318_v13 = vld [vmem:[%s3269_s21] ss:$0 sm:$0xff]  ;;  %s3274_s21 = sld [smem:[#allocation9_spill]] }
 0x4b5   : > { %2495 = vmatprep.mubr.msk.bf16.mxu0 %vm2726_vm8, %v2725_v28  ;;  %v1355_v17 = vpop.f32.mrb[22].mxu1 }
 0x4b6   : > { %2490 = vmatmul.mubr.msk.bf16.vlgmr.msra.gmra.mrb[24].mxu1 %vm934_vm10, %v1360_v11  ;;  %v1363_v18 = vpack.c.bf16 %v1353_v15, %v1353_v15  ;;  %v1356_v19 = vadd.f32 %v2310_v12, %v1355_v17  ;;  %v2480_v20 = vpop.f32.mrb[23].mxu1 }
 0x4b7   : > { %2501 = vmatprep.mubr.msk.bf16.mxu1 %vm2726_vm8, %v2725_v28 }
 0x4b8   : > { %v1489_v21 = vsel %vm1071_vm11, %v1363_v18, 0  ;;  %v1364_v22 = vpack.c.bf16 %v1356_v19, %v1356_v19 }
 0x4b9   : > { %2494 = vmatpush3.bf16.msra.mxu0 %v1489_v21 }
 0x4ba   : > { %v1535_v23 = vsel %vm1071_vm11, %v1364_v22, 0  ;;  %2505 = vmatprep.subr.bf16.mxu0 %v2725_v28  ;;  %s3277_s16 = sand.u32 1, %s3274_s21  }
 0x4bb   : > { %2500 = vmatpush3.bf16.msra.mxu1 %v1535_v23  ;;  %v2728_v23 = vmov 0  }
 0x4bc   : > { %2513 = vmatprep.subr.bf16.mxu1 %v2725_v28  ;;  %2607 = vset.pattern.permute.xlu1 %v2728_v23 }
 0x4bd   : > { %2608 = vset.pattern.permute.xlu0 %v2728_v23  ;;  %v2341_v23 = vld [vmem:[%s3272_s26] ss:$0 sm:$0xff]  ;;  %s2661_s26 = sshll.u32 %s2729_s4, 4  ;;  %s2662_s26 = int_to_ptr.vmem [resolvable:$false] %s2661_s26 }
 0x587   : > { %v1405_v24 = vpop.f32.mrb[16].mxu0 }
 0x588   : > { %v1457_v25 = vmul.f32 0.25, %v1405_v24  ;;  %v2485_v26 = vpop.f32.mrb[17].mxu0  ;;  %v722_v24 = vld [vmem:[#allocation3 + $0x8] sm:$0xff] }
 0x589   : > { %v1408_v27 = vpop.f32.mrb[18].mxu0  ;;  %v1451_v29 = vpop.f32.mrb[24].mxu1 }
 0x58a   : > { %v1458_v32 = vmul.f32 0.25, %v1451_v29  ;;  %v2486_v34 = vpop.f32.mrb[19].mxu0  ;;  %v2491_v35 = vpop.f32.mrb[25].mxu1  ;;  %v1459_v36 = vadd.f32 %v2989_v14, %v1457_v25 }
 0x58b   : > { %v1454_v37 = vpop.f32.mrb[26].mxu1 }
 0x58c   : > { %v2492_v38 = vpop.f32.mrb[27].mxu1  ;;  %v1461_v39 = vsel %vm1043_vm12, %v1459_v36, -inf  ;;  %v1460_v40 = vadd.f32 %v2987_v8, %v1458_v32  ;;  %v721_v37 = vld [vmem:[#allocation3] sm:$0xff] }
 0x58d   : > { %1462 = vmax.xlane.f32.xlu0 %v1461_v39  ;;  %v2623_v38 = vld [vmem:[%s2901_s30 + $0x10] sm:$0xff]   ;;  %v2624_v39 = vld [vmem:[%s2901_s30] sm:$0xff]  }
 0x58e   : > { %v1464_v41 = vsel %vm1043_vm12, %v1460_v40, -inf }
 0x58f   : > { %1465 = vmax.xlane.f32.xlu1 %v1464_v41  ;;  %v2626_v41 = vld [vmem:[%s2901_s30 + $0x8] sm:$0xff]  }
 0x61a   : > { %v1463_v42 = vpop.xlane.xlu0 %1462 }
 0x61b   : > { %v1467_v43 = vsub.f32 %v1459_v36, %v1463_v42 }
 0x61c   : > { %v1466_v44 = vpop.xlane.xlu1 %1465 }
 0x61d   : > { %v1469_v45 = vmul.f32 1.442695, %v1467_v43  ;;  %v1468_v46 = vsub.f32 %v1460_v40, %v1466_v44  ;;  %v2625_v40 = vld [vmem:[%s2901_s30 + $0x18] sm:$0xff]  }
 0x61f   : > { %2641 = vpow2.f32 %v1469_v45  ;;  %v1471_v47 = vmul.f32 1.442695, %v1468_v46 }
 0x621   : > { %2643 = vpow2.f32 %v1471_v47 }
 0x629   : > { %v2642_v49 = vpop.eup %2641 }
 0x62a   : > { %v1473_v14 = vsel %vm1043_vm12, %v2642_v49, 0.0 }
 0x62b   : > { %v2644_v50 = vpop.eup %2643  ;;  %1474 = vadd.xlane.f32.xlu0 %v1473_v14  ;;  %v2322_v14 = vld [vmem:[%s3270_s22] ss:$0 sm:$0xff]  ;;  %s2071_s22 = sshll.u32 %s2920_s14, 4  ;;  %s3168_s22 = int_to_ptr.vmem [resolvable:$true] %s2071_s22 }
 0x62c   : > { %v1476_v51 = vsel %vm1043_vm12, %v2644_v50, 0.0  ;;  %p2664_p1 = scmp.lt.s32.totalorder %s3168_s22, %s2662_s26 }
 0x62d   : > { %1477 = vadd.xlane.f32.xlu1 %v1476_v51  ;;  %v2323_v51 = vld [vmem:[%s3271_s2] ss:$0 sm:$0xff]  ;;  %s3176_s2 = scalar_lea.sflag [#allocation6], %s3277_s16 }
 0x6b8   : > { %v1475_v8 = vpop.xlane.xlu0 %1474 }
 0x6b9   : > { %2645 = vrcp.f32 %v1475_v8 }
 0x6ba   : > { %v1478_v53 = vpop.xlane.xlu1 %1477 }
 0x6bb   : > { %2647 = vrcp.f32 %v1478_v53 }
 0x6c3   : > { %v2646_v54 = vpop.eup %2645 }
 0x6c4   : > { %v1481_v55 = vmul.f32 %v2646_v54, %v2642_v49 }
 0x6c5   : > { %v2648_v56 = vpop.eup %2647 }
 0x6c6   : > { %v1482_v57 = vmul.f32 %v2648_v56, %v2644_v50  ;;  %v1483_v58 = vpack.c.bf16 %v1481_v55, %v1481_v55 }
 0x6c8   : > { %2496 = vmatmul.mubr.msk.bf16.vlgmr.msra.gmra.mrb[20].mxu0 %vm1043_vm12, %v1483_v58  ;;  %v1484_v59 = vpack.c.bf16 %v1482_v57, %v1482_v57 }
 0x6c9   : > { %2509 = vmatprep.mubr.msk.bf16.mxu0 %vm2726_vm8, %v2725_v28  ;;  %2506 = vmatpush3.bf16.msra.mxu0 %v2621_v60 }
 0x6ca   : > { %2502 = vmatmul.mubr.msk.bf16.vlgmr.msra.gmra.mrb[28].mxu1 %vm1043_vm12, %v1484_v59  ;;  %2507 = vmatprep.subr.bf16.mxu0 %v2725_v28 }
 0x6cb   : > { %2517 = vmatprep.mubr.msk.bf16.mxu1 %vm2726_vm8, %v2725_v28  ;;  %2514 = vmatpush3.bf16.msra.mxu1 %v2623_v38 }
 0x6cc   : > { %2515 = vmatprep.subr.bf16.mxu1 %v2725_v28 }
 0x6cd   : > { %2508 = vmatpush3.bf16.msra.mxu0 %v2622_v61 }
 0x6ce   : > { %2521 = vmatprep.subr.bf16.mxu0 %v2725_v28 }
 0x6cf   : > { %2516 = vmatpush3.bf16.msra.mxu1 %v2625_v40 }
 0x6d0   : > { %2529 = vmatprep.subr.bf16.mxu1 %v2725_v28 }
 0x79b   : > { %v1525_v33 = vpop.f32.mrb[20].mxu0 }
 0x79c   : > { %v2497_v62 = vpop.f32.mrb[21].mxu0 }
 0x79d   : > { %v1528_v63 = vpop.f32.mrb[22].mxu0  ;;  %v1571_v0 = vpop.f32.mrb[28].mxu1  ;;  %v2627_v62 = vld [vmem:[%s2901_s30 + $0x20] sm:$0xff]  }
 0x79e   : > { %v2602_v1 = vpack.i.bf16 %v1571_v0, %v1525_v33  ;;  %v2498_v2 = vpop.f32.mrb[23].mxu0  ;;  %v2503_v3 = vpop.f32.mrb[29].mxu1 }
 0x79f   : > { %v1574_v4 = vpop.f32.mrb[30].mxu1 }
 0x7a0   : > { %2603 = vrot.lane.b32.xlu0 %v2602_v1, %s2727_s1  ;;  %v2504_v5 = vpop.f32.mrb[31].mxu1  ;;  %v2628_v4 = vld [vmem:[%s2901_s30 + $0x28] sm:$0xff]   ;;  %s2657_s30 = scalar_lea.vmem %s3168_s22, 256 }
 0x7a1   : > { %p2658_p12 = scmp.ne.s32.totalorder %s3168_s22, %s2657_s30 }
 0x7a3   : > { %p2659_p13 = pnand %p2658_p12, %p2845_p5 }
 0x7a4   : > { %1709 = vperm.xlu0 %2608, %v722_v24  }
 0x7a5   : > { %p2660_p0 = pneg %p2659_p13 }
 0x812   : > { %v2604_v6 = vpop.permute.xlu0 %2603 }
 0x813   : > { %v2606_v7 = vunpack.i.h.bf16 %v2604_v6  ;;  %v2605_v9 = vunpack.i.l.bf16 %v2604_v6 }
 0x815   : > { %v1586_v10 = vsel %vm934_vm10, %v3027_v48, %v2606_v7  ;;  %v1585_v11 = vsel %vm934_vm10, %v3029_v52, %v2605_v9  ;;  %v2629_v9 = vld [vmem:[%s2906_s0] sm:$0xff]  }
 0x816   : > { %v1587_v12 = vpack.c.bf16 %v1586_v10, %v1585_v11  ;;  %v2630_v10 = vld [vmem:[%s2906_s0 + $0x8] sm:$0xff]   ;;  %v2631_v11 = vld [vmem:[%s2906_s0 + $0x10] sm:$0xff]  }
 0x818   : > { %2510 = vmatmul.mubr.msk.bf16.vlgmr.msra.gmra.mrb[24].mxu0 %vm751_vm9, %v1587_v12  ;;  %v2632_v12 = vld [vmem:[%s2906_s0 + $0x18] sm:$0xff]   ;;  %s2663_s0 = scalar_lea.vmem %s2662_s26, 512 }
 0x819   : > { %2525 = vmatprep.mubr.msk.bf16.mxu0 %vm2726_vm8, %v2725_v28  ;;  %2522 = vmatpush3.bf16.msra.mxu0 %v2624_v39  ;;  %p2665_p2 = scmp.lt.s32.totalorder %s2663_s0, %s2657_s30 }
 0x81a   : > { %2523 = vmatprep.subr.bf16.mxu0 %v2725_v28 }
 0x81b   : > { %p2666_p3 = por %p2665_p2, %p2664_p1 }
 0x81d   : > { %2524 = vmatpush3.bf16.msra.mxu0 %v2626_v41  ;;  %p2667_p4 = pnand %p2666_p3, %p2660_p0 }
 0x81e   : > { %2537 = vmatprep.subr.bf16.mxu0 %v2725_v28 }
 0x823   : > { %v3105_v59 = vpop.permute.xlu0 %1709 }
 0x8eb   : > { %v1648_v15 = vpop.f32.mrb[24].mxu0 }
 0x8ec   : > { %v1649_v16 = vadd.f32 %v2318_v13, %v1648_v15  ;;  %v2511_v17 = vpop.f32.mrb[25].mxu0 }
 0x8ed   : > { %v1651_v18 = vpop.f32.mrb[26].mxu0 }
 0x8ee   : > { %v1652_v19 = vadd.f32 %v2318_v13, %v1651_v18  ;;  %v2512_v48 = vpop.f32.mrb[27].mxu0  ;;  %v1655_v20 = vadd.f32 %v1649_v16, %v2938_v30 }
 0x8f0   : > { %v1657_v52 = vsel %vm751_vm9, %v1655_v20, 0.0  ;;  %v1656_v21 = vadd.f32 %v1652_v19, %v2940_v31 }
 0x8f1   : > { %1658 = vadd.xlane.f32.xlu1 %v1657_v52 }
 0x8f2   : > { %v1660_v22 = vsel %vm751_vm9, %v1656_v21, 0.0 }
 0x8f5   : > { %1661 = vadd.xlane.f32.xlu1 %v1660_v22 }
 0x97e   : > { %v1659_v25 = vpop.xlane.xlu1 %1658 }
 0x97f   : > { %v1664_v26 = vmul.f32 0.03125, %v1659_v25 }
 0x981   : > { %v1666_v27 = vsub.f32 %v1655_v20, %v1664_v26 }
 0x982   : > { %v1662_v30 = vpop.xlane.xlu1 %1661 }
 0x983   : > { %v1665_v29 = vmul.f32 0.03125, %v1662_v30  ;;  %v1668_v32 = vmul.f32 %v1666_v27, %v1666_v27 }
 0x985   : > { %v1667_v31 = vsub.f32 %v1656_v21, %v1665_v29  ;;  %v1670_v34 = vsel %vm751_vm9, %v1668_v32, 0.0 }
 0x986   : > { %1671 = vadd.xlane.f32.xlu1 %v1670_v34 }
 0x987   : > { %v1669_v35 = vmul.f32 %v1667_v31, %v1667_v31 }
 0x989   : > { %v1673_v36 = vsel %vm751_vm9, %v1669_v35, 0.0  ;;  %v2342_v35 = vld [vmem:[%s634_s18] ss:$0 sm:$0xff]  ;;  %s3273_s18 = sld [smem:[#allocation12_spill]] }
 0x98a   : > { %1674 = vadd.xlane.f32.xlu1 %v1673_v36 }
 0x98f   : > { %s2357_s15 = sshll.u32 %s3273_s18, 8 }
 0x99b   : > { %1704 = vperm.xlu1 %2607, %v721_v37  }
 0xa13   : > { %v1672_v42 = vpop.xlane.xlu1 %1671 }
 0xa14   : > { %v1676_v43 = vmul.f32 0.03125, %v1672_v42 }
 0xa16   : > { %v1678_v44 = vadd.f32 1e-05, %v1676_v43 }
 0xa17   : > { %v1675_v45 = vpop.xlane.xlu1 %1674 }
 0xa18   : > { %2649 = vrsqrt.f32 %v1678_v44  ;;  %v1677_v46 = vmul.f32 0.03125, %v1675_v45 }
 0xa1a   : > { %v1679_v47 = vadd.f32 1e-05, %v1677_v46 }
 0xa1b   : > { %v3100_v54 = vpop.permute.xlu1 %1704 }
 0xa1c   : > { %2651 = vrsqrt.f32 %v1679_v47 }
 0xa22   : > { %v2650_v49 = vpop.eup %2649 }
 0xa23   : > { %v1682_v50 = vmul.f32 %v2650_v49, %v1666_v27 }
 0xa25   : > { %v1691_v8 = vmul.f32 %v2322_v14, %v1682_v50 }
 0xa26   : > { %v2652_v53 = vpop.eup %2651 }
 0xa27   : > { %v1700_v55 = vadd.f32 %v2323_v51, %v1691_v8  ;;  %v1683_v56 = vmul.f32 %v2652_v53, %v1667_v31 }
 0xa29   : > { %v3103_v57 = vmul.f32 %v3100_v54, %v1700_v55  ;;  %v1692_v58 = vmul.f32 %v2322_v14, %v1683_v56 }
 0xa2b   : > { %1714 = vst.msk [vmem:[#allocation2 + $0x1] sm:$0xff] %vm751_vm9, %v3103_v57  ;;  %v1701_v60 = vadd.f32 %v2323_v51, %v1692_v58 }
 0xa2d   : > { %v3110_v61 = vmul.f32 %v3105_v59, %v1701_v60 }
 0xa2f   : > { %1715 = vst.msk [vmem:[#allocation2 + $0x11] sm:$0xff] %vm751_vm9, %v3110_v61 }
 0xa32   : > { %v1723_v33 = vld [vmem:[#allocation2 + $0x1] sm:$0xff] }
 0xa33   : > { %v1716_v0 = vld [vmem:[#allocation2] sm:$0xff] }
 0xa34   : > { %v1843_v6 = vld [vmem:[#allocation2 + $0x2] sm:$0xff] }
 0xa36   : > { %v1724_v63 = vld [vmem:[#allocation2 + $0x11] sm:$0xff] }
 0xa37   : > { %v1717_v1 = vld [vmem:[#allocation2 + $0x10] sm:$0xff]  ;;  %v1725_v2 = vpack.c.bf16 %v1724_v63, %v1723_v33 }
 0xa38   : > { %v1718_v3 = vpack.c.bf16 %v1717_v1, %v1716_v0  ;;  %v1844_v5 = vld [vmem:[#allocation2 + $0x12] sm:$0xff]  ;;  %v2348_v0 = vld [vmem:[%s637_s19] ss:$0 sm:$0xff] }
 0xa39   : > { %2518 = vmatmul.mubr.msk.bf16.vlgmr.msra.gmra.mrb[32].mxu1 %vm751_vm9, %v1725_v2  ;;  %v1845_v7 = vpack.c.bf16 %v1844_v5, %v1843_v6  ;;  %v2349_v2 = vld [vmem:[%s640_s3] ss:$0 sm:$0xff]  ;;  %s3276_s3 = sld [smem:[#allocation22_spill]] }
 0xa3a   : > { %2526 = vmatmul.mubr.msk.bf16.vlgmr.msra.gmra.mrb[28].mxu0 %vm751_vm9, %v1718_v3  ;;  %2530 = vmatpush3.bf16.msra.mxu1 %v2627_v62 }
 0xa3b   : > { %2533 = vmatprep.mubr.msk.bf16.mxu1 %vm2726_vm8, %v2725_v28  ;;  %2531 = vmatprep.subr.bf16.mxu1 %v2725_v28 }
 0xa3c   : > { %2545 = vmatprep.mubr.msk.bf16.mxu0 %vm2726_vm8, %v2725_v28  ;;  %2538 = vmatpush3.bf16.msra.mxu0 %v2629_v9 }
 0xa3d   : > { %2539 = vmatprep.subr.bf16.mxu0 %v2725_v28 }
 0xa3e   : > { %2532 = vmatpush3.bf16.msra.mxu1 %v2628_v4 }
 0xa3f   : > { %s3166_s29 = scalar_lea.hbm %s3276_s3, %s2357_s15 }
 0xa40   : > { %2540 = vmatpush3.bf16.msra.mxu0 %v2630_v10 }
 0xa41   : > { %2534 = vmatmul.mubr.msk.bf16.vlgmr.msra.gmra.mrb[36].mxu1 %vm751_vm9, %v1845_v7  ;;  %2541 = vmatprep.subr.bf16.mxu0 %v2725_v28 }
 0xa44   : > { %2542 = vmatpush3.bf16.msra.mxu0 %v2631_v11 }
 0xa45   : > { %2543 = vmatprep.subr.bf16.mxu0 %v2725_v28 }
 0xa48   : > { %2544 = vmatpush3.bf16.msra.mxu0 %v2632_v12 }
 0xb0c   : > { %v1780_v13 = vpop.f32.mrb[32].mxu1 }
 0xb0d   : > { %v1836_v15 = vpop.f32.mrb[28].mxu0  ;;  %v2519_v17 = vpop.f32.mrb[33].mxu1 }
 0xb0e   : > { %v1837_v16 = vadd.f32 %v1836_v15, %v1780_v13  ;;  %v2527_v18 = vpop.f32.mrb[29].mxu0  ;;  %v1783_v19 = vpop.f32.mrb[34].mxu1 }
 0xb0f   : > { %v1839_v48 = vpop.f32.mrb[30].mxu0  ;;  %v2520_v52 = vpop.f32.mrb[35].mxu1 }
 0xb10   : > { %v1840_v20 = vadd.f32 %v1839_v48, %v1783_v19  ;;  %v2528_v21 = vpop.f32.mrb[31].mxu0 }
 0xb14   : > { %v1900_v22 = vpop.f32.mrb[36].mxu1 }
 0xb15   : > { %v1907_v28 = vadd.f32 %v1900_v22, %v1837_v16  ;;  %v2535_v24 = vpop.f32.mrb[37].mxu1 }
 0xb16   : > { %v1903_v25 = vpop.f32.mrb[38].mxu1 }
 0xb17   : > { %v1916_v26 = vadd.f32 %v2341_v23, %v1907_v28  ;;  %v1908_v27 = vadd.f32 %v1903_v25, %v1840_v20  ;;  %v2536_v30 = vpop.f32.mrb[39].mxu1 }
 0xb19   : > { %v1917_v29 = vadd.f32 %v2341_v23, %v1908_v27  ;;  %v1918_v32 = vmax.f32 %v1916_v26, 0.0 }
 0xb1b   : > { %v1919_v31 = vmax.f32 %v1917_v29, 0.0 }
 0xb1d   : > { %v1920_v34 = vpack.c.bf16 %v1919_v31, %v1918_v32 }
 0xb1f   : > { %2546 = vmatmul.mubr.msk.bf16.vlgmr.msra.gmra.mrb[32].mxu0 %vm1960_vm13, %v1920_v34 }
 0xbf2   : > { %v1998_v36 = vpop.f32.mrb[32].mxu0 }
 0xbf3   : > { %v1999_v37 = vadd.f32 %v2342_v35, %v1998_v36  ;;  %v2547_v38 = vpop.f32.mrb[33].mxu0 }
 0xbf4   : > { %v2001_v39 = vpop.f32.mrb[34].mxu0 }
 0xbf5   : > { %v2002_v40 = vadd.f32 %v2342_v35, %v2001_v39  ;;  %v2548_v41 = vpop.f32.mrb[35].mxu0  ;;  %v2005_v42 = vadd.f32 %v1999_v37, %v3103_v57 }
 0xbf7   : > { %v2007_v43 = vsel %vm751_vm9, %v2005_v42, 0.0  ;;  %v2006_v44 = vadd.f32 %v2002_v40, %v3110_v61 }
 0xbf8   : > { %2008 = vadd.xlane.f32.xlu0 %v2007_v43 }
 0xbf9   : > { %v2010_v45 = vsel %vm751_vm9, %v2006_v44, 0.0 }
 0xbfa   : > { %2011 = vadd.xlane.f32.xlu1 %v2010_v45 }
 0xc85   : > { %v2009_v46 = vpop.xlane.xlu0 %2008 }
 0xc86   : > { %v2013_v47 = vmul.f32 0.03125, %v2009_v46 }
 0xc87   : > { %v2012_v49 = vpop.xlane.xlu1 %2011 }
 0xc88   : > { %v2015_v14 = vsub.f32 %v2005_v42, %v2013_v47  ;;  %v2014_v50 = vmul.f32 0.03125, %v2012_v49 }
 0xc8a   : > { %v2016_v51 = vsub.f32 %v2006_v44, %v2014_v50  ;;  %v2017_v8 = vmul.f32 %v2015_v14, %v2015_v14 }
 0xc8c   : > { %v2019_v53 = vsel %vm751_vm9, %v2017_v8, 0.0  ;;  %v2018_v55 = vmul.f32 %v2016_v51, %v2016_v51 }
 0xc8d   : > { %2020 = vadd.xlane.f32.xlu0 %v2019_v53 }
 0xc8e   : > { %v2022_v56 = vsel %vm751_vm9, %v2018_v55, 0.0 }
 0xc91   : > { %2023 = vadd.xlane.f32.xlu0 %v2022_v56 }
 0xd1a   : > { %v2021_v57 = vpop.xlane.xlu0 %2020 }
 0xd1b   : > { %v2025_v58 = vmul.f32 0.03125, %v2021_v57 }
 0xd1d   : > { %v2027_v60 = vadd.f32 1e-05, %v2025_v58 }
 0xd1e   : > { %v2024_v61 = vpop.xlane.xlu0 %2023 }
 0xd1f   : > { %2653 = vrsqrt.f32 %v2027_v60  ;;  %v2026_v33 = vmul.f32 0.03125, %v2024_v61 }
 0xd21   : > { %v2028_v62 = vadd.f32 1e-05, %v2026_v33 }
 0xd23   : > { %2655 = vrsqrt.f32 %v2028_v62 }
 0xd29   : > { %v2654_v63 = vpop.eup %2653 }
 0xd2a   : > { %v2031_v1 = vmul.f32 %v2654_v63, %v2015_v14 }
 0xd2c   : > { %v2040_v3 = vmul.f32 %v2348_v0, %v2031_v1 }
 0xd2d   : > { %v2656_v4 = vpop.eup %2655 }
 0xd2e   : > { %v2032_v5 = vmul.f32 %v2656_v4, %v2016_v51  ;;  %v2049_v6 = vadd.f32 %v2349_v2, %v2040_v3 }
 0xd30   : > { %v2041_v7 = vmul.f32 %v2348_v0, %v2032_v5  ;;  %v2051_v9 = vmul.f32 %v2049_v6, %v3100_v54 }
 0xd32   : > { %v2050_v10 = vadd.f32 %v2349_v2, %v2041_v7  ;;  %2053 = vst.msk [vmem:[#allocation2 + $0x1] sm:$0xff] %vm751_vm9, %v2051_v9  ;;  %2055 = vst.msk [vmem:[%s2920_s14] sm:$0xff] %vm751_vm9, %v2051_v9 }
 0xd34   : > { %v2052_v11 = vmul.f32 %v2050_v10, %v3105_v59 }
 0xd36   : > { %2054 = vst.msk [vmem:[#allocation2 + $0x11] sm:$0xff] %vm751_vm9, %v2052_v11  ;;  %2056 = vst.msk [vmem:[%s2920_s14 + $0x8] sm:$0xff] %vm751_vm9, %v2052_v11 }
 0xd37   : > { %2670 = shalt.err (!%p2667_p4)
}
 0xd38   : > { %s2671_s14 = scalar_lea.hbm %s3166_s29, 256  ;;  %s2675_s17 = scalar_lea.hbm %s3276_s3, 512 }
 0xd39   : > { %p2672_p7 = scmp.ne.s32.totalorder %s3166_s29, %s2671_s14  ;;  %p2676_p10 = scmp.lt.u32.totalorder %s3166_s29, %s3276_s3 }
 0xd3a   : > { %p2677_p11 = scmp.lt.u32.totalorder %s2675_s17, %s2671_s14  ;;  %p2679_p13 = scmp.lt.u32.totalorder %s2671_s14, %s3166_s29 }
 0xd3b   : > { %p2673_p8 = pnand %p2672_p7, %p2845_p5 }
 0xd3c   : > { %p2678_p12 = por %p2677_p11, %p2676_p10 }
 0xd3d   : > { %p2674_p9 = pneg %p2673_p8 }
 0xd3e   : > { %p2680_p0 = por %p2679_p13, %p2678_p12 }
 0xd40   : > { %p2681_p1 = pnand %p2680_p0, %p2674_p9 }
 0xd42   : > { %2684 = shalt.err (!%p2681_p1)
}
 0xd43   : > { %s2730_s25 = smov 128   ;;  %s2731_s21 = smov 8  }
 0xd44   : > { %2552 = dma.vmem_to_hbm [thread:$0]  (%p2845_p5), %s3168_s22, 256, %s3166_s29, %s3176_s2, %s2730_s25, %s2730_s25, %s2731_s21  }
 0xd45 PF: > { %s3278_s15 = sld [smem:[#allocation11_spill]]  ;;  %s3279_s19 = sld [smem:[#allocation8_spill]] }
 0xd4b   : > { %p2558_p2 = scmp.ge.s32.totalorder %s3278_s15, 2  ;;  %s2086_s16 = sand.u32 1, %s3279_s19  }
 0xd4c   : > { %s2087_s30 = scalar_lea.sflag [#allocation6], %s2086_s16 }
 0xd4d   : > { %p2555_p3 = pnand %p2558_p2, %p2849_p6 }
 0xd4f   : > { %2702 = dma.done.wait (!%p2555_p3), %s2087_s30, 256  }
 0xd50   : > { %2704 = vsyncadd (!%p2555_p3), %s2087_s30, 4294967040  ;;  %s3281_s16 = sld [smem:[#allocation13_spill]]  ;;  %s3282_s29 = sld [smem:[#allocation9_spill]] }
 0xd51   : > { %s3283_s30 = sld [smem:[#allocation10_spill]]  ;;  %s3284_s15 = sld [smem:[#allocation14_spill]] }
 0xd56   : > { %p24_p4 = scmp.ge.s32.totalorder %s3281_s16, 4  }
 0xd58   :  { %26 = sbr.rel (!%p24_p4) target bundleno = 10 (0xa), region = 160 }
 0xd5f   :  { %2092 = vsyncpa [#allocation6], 1 }
 0xd60   :  { %2094 = vsyncpa [#allocation6 + $0x1], 1 }

</bundles_post_ra>
